<compile_context>
chip_gen: v5e
topology: v5e:2x2
jax: 0.10.0
libtpu: 0.0.40
codegen_flags: <defaults>
</compile_context>

<pallas_src>
import functools

import jax
import jax.numpy as jnp
import numpy as np
from jax import lax
from jax.experimental import pallas as pl
from jax.experimental.pallas import tpu as pltpu

# ----------------------- problem sizes (small, deterministic) -----------------------
B = 2          # meta batch size (tasks)
N_CTX = 64     # context points per task
N_Q = 64       # query points per task
IN_DIM = 2     # coordinate dim
HID = 32       # hidden width of hypo MLP
OUT = 3        # output dim (e.g. RGB)
STEPS = 3      # num_meta_steps
LR = 0.01      # init_lr, lr_type='static'


# ------------------------------------ kernel ----------------------------------------
def maml_kernel(xc_ref, yct_ref, xq_ref, w1a_ref, w2at_ref,
                out_ref, interm_ref, *, tb, num_steps, eff_lr):
    # augmented meta-init parameters, loaded once per grid step (shared across tasks)
    w1a_0 = w1a_ref[...]     # (IN_DIM+1, HID)  rows: [W1_row0; W1_row1; b1]
    w2at_0 = w2at_ref[...]   # (OUT, HID+1)     cols: [W2^T | b2^T]

    n_ctx = xc_ref.shape[1]
    in_dim = xc_ref.shape[2]
    n_q = xq_ref.shape[1]
    hid = w1a_ref.shape[1]

    ones_c = jnp.ones((n_ctx, 1), jnp.float32)
    ones_q = jnp.ones((n_q, 1), jnp.float32)

    for t in range(tb):                      # tasks handled by this grid step
        xc = xc_ref[t]                       # (N_CTX, IN_DIM)
        yct = yct_ref[t]                     # (OUT, N_CTX)  -- pre-transposed by wrapper
        xq = xq_ref[t]                       # (N_Q, IN_DIM)

        # hoisted loop-invariant lane-broadcasts + augmented context input [xc | 1]
        xc_cols = [jnp.broadcast_to(xc[:, d:d + 1], (n_ctx, hid)) for d in range(in_dim)]
        xc_aug = jnp.concatenate([xc, ones_c], axis=1)           # (N_CTX, IN_DIM+1)

        # fast params live in vregs (values), not VMEM scratch
        fw1a, fw2at = w1a_0, w2at_0

        for step in range(num_steps):
            # hypo forward on context: first layer as VPU broadcast-FMA (K = IN_DIM = 2)
            z = jnp.broadcast_to(fw1a[in_dim:in_dim + 1, :], (n_ctx, hid))   # bias row
            for d in range(in_dim):
                z = z + xc_cols[d] * fw1a[d:d + 1, :]
            mask = z > 0.0
            h = jnp.maximum(z, 0.0)                                          # (N_CTX, HID)
            h_aug = jnp.concatenate([h, ones_c], axis=1)                     # (N_CTX, HID+1)

            # second layer in (OUT, N_CTX) orientation; bias folded into the matmul
            pred_t = lax.dot_general(fw2at, h_aug, (((1,), (1,)), ((), ())),
                                     preferred_element_type=jnp.float32)    # (OUT, N_CTX)

            # lane-dense (64-lane) per-step store; no stacked intermediates
            interm_ref[t, step] = pred_t

            # analytic backward (mean-MSE scale 2/(B*N*OUT) folded into eff_lr)
            dpred_t = pred_t - yct                                           # (OUT, N_CTX)
            dw2at = lax.dot_general(dpred_t, h_aug, (((1,), (0,)), ((), ())),
                                    preferred_element_type=jnp.float32)     # (OUT, HID+1) = [dW2^T | db2^T]
            dh = lax.dot_general(dpred_t, fw2at[:, :hid], (((0,), (0,)), ((), ())),
                                 preferred_element_type=jnp.float32)        # (N_CTX, HID)
            dz = jnp.where(mask, dh, 0.0)
            dw1a = lax.dot_general(xc_aug, dz, (((0,), (0,)), ((), ())),
                                   preferred_element_type=jnp.float32)      # (IN_DIM+1, HID) = [dW1; db1]

            # SGD update (lr_type='static'); only two fused tensors, kept in vregs
            fw1a = fw1a - eff_lr * dw1a
            fw2at = fw2at - eff_lr * dw2at

        # hypo forward on query with adapted fast params (runs once)
        zq = jnp.broadcast_to(fw1a[in_dim:in_dim + 1, :], (n_q, hid))
        for d in range(in_dim):
            zq = zq + jnp.broadcast_to(xq[:, d:d + 1], (n_q, hid)) * fw1a[d:d + 1, :]
        hq = jnp.maximum(zq, 0.0)
        hq_aug = jnp.concatenate([hq, ones_q], axis=1)                       # (N_Q, HID+1)
        oq_t = lax.dot_general(fw2at, hq_aug, (((1,), (1,)), ((), ())),
                               preferred_element_type=jnp.float32)           # (OUT, N_Q)
        out_ref[t] = oq_t                                                    # lane-dense store


# ------------------------------------ wrapper ----------------------------------------
def _default_tasks_per_block(bsz):
    """Default: 1 task/grid step on 2-TC chips (v7x: 'parallel' splits across cores);
    collapse the grid to one step with an in-kernel task loop on 1-TC chips."""
    try:
        kind = jax.devices()[0].device_kind.lower()
    except Exception:
        kind = ""
    if "v7" in kind:
        return 1
    return bsz


def maml_forward(xc, yc, xq, w1, b1, w2, b2, *, num_steps=STEPS, lr=LR,
                 tasks_per_block=None):
    bsz, n_ctx, d_in = xc.shape
    d_out = yc.shape[-1]
    n_q = xq.shape[1]
    hid = w1.shape[1]
    # loss = mean over ALL (B * N_CTX * OUT) elements -> gradient scale 2/(B*N*D),
    # folded into the learning rate.
    eff_lr = lr * 2.0 / float(bsz * n_ctx * d_out)

    tb = tasks_per_block if tasks_per_block is not None else _default_tasks_per_block(bsz)
    assert bsz % tb == 0
    grid = (bsz // tb,)

    # pure-XLA layout plumbing: sublane-oriented targets + augmented weights
    yct = jnp.transpose(yc, (0, 2, 1))                 # (B, OUT, N_CTX)
    w1a = jnp.concatenate([w1, b1], axis=0)            # (IN_DIM+1, HID)  = [W1; b1]
    w2at = jnp.concatenate([w2.T, b2.T], axis=1)       # (OUT, HID+1)     = [W2^T | b2^T]

    kern = functools.partial(maml_kernel, tb=tb, num_steps=num_steps, eff_lr=eff_lr)

    grid_spec = pltpu.PrefetchScalarGridSpec(
        num_scalar_prefetch=0,
        grid=grid,
        in_specs=[
            pl.BlockSpec((tb, n_ctx, d_in), lambda b: (b, 0, 0)),        # context x
            pl.BlockSpec((tb, d_out, n_ctx), lambda b: (b, 0, 0)),       # context y (transposed)
            pl.BlockSpec((tb, n_q, d_in), lambda b: (b, 0, 0)),          # query x
            pl.BlockSpec((d_in + 1, hid), lambda b: (0, 0)),             # [W1; b1]
            pl.BlockSpec((d_out, hid + 1), lambda b: (0, 0)),            # [W2^T | b2^T]
        ],
        out_specs=[
            pl.BlockSpec((tb, d_out, n_q), lambda b: (b, 0, 0)),                    # model_out (transposed)
            pl.BlockSpec((tb, num_steps, d_out, n_ctx), lambda b: (b, 0, 0, 0)),    # intermed (transposed)
        ],
    )

    # advisory cost hint for the XLA scheduler
    flops_step = 2 * n_ctx * (d_in * hid + 2 * d_out * (hid + 1)
                              + d_out * hid + (d_in + 1) * hid)
    flops_q = 2 * n_q * (d_in * hid + d_out * (hid + 1))
    cost = pl.CostEstimate(
        flops=bsz * (num_steps * flops_step + flops_q),
        transcendentals=0,
        bytes_accessed=4 * (xc.size + yc.size + xq.size + w1a.size + w2at.size
                            + bsz * d_out * n_q + bsz * num_steps * d_out * n_ctx))

    out_t, interm_t = pl.pallas_call(
        kern,
        out_shape=(jax.ShapeDtypeStruct((bsz, d_out, n_q), jnp.float32),
                   jax.ShapeDtypeStruct((bsz, num_steps, d_out, n_ctx), jnp.float32)),
        grid_spec=grid_spec,
        compiler_params=pltpu.CompilerParams(dimension_semantics=("parallel",)),
        cost_estimate=cost,
    )(xc, yct, xq, w1a, w2at)

    # transpose back to the PyTorch out_dict layout (pure XLA layout plumbing)
    model_out = jnp.transpose(out_t, (0, 2, 1))                               # (B, N_Q, OUT)
    intermed = [jnp.transpose(interm_t[:, j], (0, 2, 1)) for j in range(num_steps)]
    return {"model_out": model_out, "intermed_predictions": intermed}


# ------------------------------- pure-JAX reference -----------------------------------
def ref_forward(xc, yc, xq, w1, b1, w2, b2, *, num_steps=STEPS, lr=LR):
    bsz = xc.shape[0]
    fp = {
        "w1": jnp.broadcast_to(w1, (bsz,) + w1.shape),
        "b1": jnp.broadcast_to(b1, (bsz,) + b1.shape),
        "w2": jnp.broadcast_to(w2, (bsz,) + w2.shape),
        "b2": jnp.broadcast_to(b2, (bsz,) + b2.shape),
    }

    def hypo(x, p):
        z = jnp.einsum("bni,bih->bnh", x, p["w1"]) + p["b1"]
        h = jnp.where(z > 0.0, z, 0.0)
        return jnp.einsum("bnh,bho->bno", h, p["w2"]) + p["b2"]

    interms = []
    for _ in range(num_steps):
        def loss_fn(p):
            pred = hypo(xc, p)
            return jnp.mean((pred - yc) ** 2), pred

        (_, pred), grads = jax.value_and_grad(loss_fn, has_aux=True)(fp)
        interms.append(pred)
        fp = {k: fp[k] - lr * grads[k] for k in fp}
    return hypo(xq, fp), interms


# --------------------------------------- main -----------------------------------------
if __name__ == "__main__":
    key = jax.random.PRNGKey(0)
    k_xc, k_yc, k_xq, k_w1, k_b1, k_w2, k_b2 = jax.random.split(key, 7)

    # meta batch: context (x, y) and query x
    xc = jax.random.uniform(k_xc, (B, N_CTX, IN_DIM), jnp.float32, -1.0, 1.0)
    yc = jax.random.uniform(k_yc, (B, N_CTX, OUT), jnp.float32, -1.0, 1.0)
    xq = jax.random.uniform(k_xq, (B, N_Q, IN_DIM), jnp.float32, -1.0, 1.0)

    # deterministic hypo_module parameters (meta init)
    w1 = jax.random.normal(k_w1, (IN_DIM, HID), jnp.float32) * (1.0 / np.sqrt(IN_DIM))
    b1 = jax.random.normal(k_b1, (1, HID), jnp.float32) * 0.01
    w2 = jax.random.normal(k_w2, (HID, OUT), jnp.float32) * (1.0 / np.sqrt(HID))
    b2 = jax.random.normal(k_b2, (1, OUT), jnp.float32) * 0.01

    out_dict = maml_forward(xc, yc, xq, w1, b1, w2, b2)
    jax.block_until_ready(out_dict["model_out"])
    jax.block_until_ready(out_dict["intermed_predictions"][-1])

    # correctness vs autodiff reference
    ref_out, ref_interms = ref_forward(xc, yc, xq, w1, b1, w2, b2)
    np.testing.assert_allclose(np.asarray(out_dict["model_out"]),
                               np.asarray(ref_out), rtol=1e-5, atol=1e-5)
    for j in range(STEPS):
        np.testing.assert_allclose(np.asarray(out_dict["intermed_predictions"][j]),
                                   np.asarray(ref_interms[j]), rtol=1e-5, atol=1e-5)

    print("KERNEL_OK")
</pallas_src>

<mosaic_0001>
module attributes {stable_mosaic.version = 11 : i64} {
  func.func @maml_kernel(%arg0: i32, %arg1: memref<2x64x2xf32, #tpu.memory_space<vmem>>, %arg2: memref<2x3x64xf32, #tpu.memory_space<vmem>>, %arg3: memref<2x64x2xf32, #tpu.memory_space<vmem>>, %arg4: memref<3x32xf32, #tpu.memory_space<vmem>>, %arg5: memref<3x33xf32, #tpu.memory_space<vmem>>, %arg6: memref<2x3x64xf32, #tpu.memory_space<vmem>>, %arg7: memref<2x3x3x64xf32, #tpu.memory_space<vmem>>) attributes {dimension_semantics = [#tpu.dimension_semantics<parallel>], iteration_bounds = array<i64: 1>, scalar_prefetch = 0 : i64, scratch_operands = 0 : i64, tpu.core_type = #tpu.core_type<tc>, window_params = [{transform_indices = @transform_0, window_bounds = array<i64: 2, 64, 2>}, {transform_indices = @transform_1, window_bounds = array<i64: 2, 3, 64>}, {transform_indices = @transform_2, window_bounds = array<i64: 2, 64, 2>}, {pipeline_mode = #tpu.pipeline_mode<synchronous>, transform_indices = @transform_3, window_bounds = array<i64: 3, 32>}, {pipeline_mode = #tpu.pipeline_mode<synchronous>, transform_indices = @transform_4, window_bounds = array<i64: 3, 33>}, {transform_indices = @transform_5, window_bounds = array<i64: 2, 3, 64>}, {transform_indices = @transform_6, window_bounds = array<i64: 2, 3, 3, 64>}]} {
    %c0 = arith.constant 0 : index
    %c0_0 = arith.constant 0 : index
    %0 = vector.load %arg4[%c0, %c0_0] : memref<3x32xf32, #tpu.memory_space<vmem>>, vector<3x32xf32>
    %c0_1 = arith.constant 0 : index
    %c0_2 = arith.constant 0 : index
    %1 = vector.load %arg5[%c0_1, %c0_2] : memref<3x33xf32, #tpu.memory_space<vmem>>, vector<3x33xf32>
    %cst = arith.constant 1.000000e+00 : f32
    %2 = vector.broadcast %cst : f32 to vector<64x1xf32>
    %cst_3 = arith.constant 1.000000e+00 : f32
    %3 = vector.broadcast %cst_3 : f32 to vector<64x1xf32>
    %c0_4 = arith.constant 0 : index
    %c0_5 = arith.constant 0 : index
    %c0_6 = arith.constant 0 : index
    %4 = vector.load %arg1[%c0_4, %c0_5, %c0_6] : memref<2x64x2xf32, #tpu.memory_space<vmem>>, vector<1x64x2xf32>
    %5 = vector.shape_cast %4 : vector<1x64x2xf32> to vector<64x2xf32>
    %c0_7 = arith.constant 0 : index
    %c0_8 = arith.constant 0 : index
    %c0_9 = arith.constant 0 : index
    %6 = vector.load %arg2[%c0_7, %c0_8, %c0_9] : memref<2x3x64xf32, #tpu.memory_space<vmem>>, vector<1x3x64xf32>
    %7 = vector.shape_cast %6 : vector<1x3x64xf32> to vector<3x64xf32>
    %c0_10 = arith.constant 0 : index
    %c0_11 = arith.constant 0 : index
    %c0_12 = arith.constant 0 : index
    %8 = vector.load %arg3[%c0_10, %c0_11, %c0_12] : memref<2x64x2xf32, #tpu.memory_space<vmem>>, vector<1x64x2xf32>
    %9 = vector.shape_cast %8 : vector<1x64x2xf32> to vector<64x2xf32>
    %10 = vector.extract_strided_slice %5 {offsets = [0, 0], sizes = [64, 1], strides = [1, 1]} : vector<64x2xf32> to vector<64x1xf32>
    %11 = vector.shape_cast %10 : vector<64x1xf32> to vector<64x1xf32>
    %12 = vector.broadcast %11 : vector<64x1xf32> to vector<64x32xf32>
    %13 = vector.extract_strided_slice %5 {offsets = [0, 1], sizes = [64, 1], strides = [1, 1]} : vector<64x2xf32> to vector<64x1xf32>
    %14 = vector.shape_cast %13 : vector<64x1xf32> to vector<64x1xf32>
    %15 = vector.broadcast %14 : vector<64x1xf32> to vector<64x32xf32>
    %16 = tpu.concatenate %5, %2 in 1 : vector<64x2xf32>, vector<64x1xf32> -> vector<64x3xf32>
    %17 = vector.extract_strided_slice %0 {offsets = [2, 0], sizes = [1, 32], strides = [1, 1]} : vector<3x32xf32> to vector<1x32xf32>
    %18 = vector.shape_cast %17 : vector<1x32xf32> to vector<1x32xf32>
    %19 = vector.broadcast %18 : vector<1x32xf32> to vector<64x32xf32>
    %20 = vector.extract_strided_slice %0 {offsets = [0, 0], sizes = [1, 32], strides = [1, 1]} : vector<3x32xf32> to vector<1x32xf32>
    %21 = vector.broadcast %20 : vector<1x32xf32> to vector<64x32xf32>
    %22 = arith.mulf %12, %21 : vector<64x32xf32>
    %23 = arith.addf %19, %22 : vector<64x32xf32>
    %24 = vector.extract_strided_slice %0 {offsets = [1, 0], sizes = [1, 32], strides = [1, 1]} : vector<3x32xf32> to vector<1x32xf32>
    %25 = vector.broadcast %24 : vector<1x32xf32> to vector<64x32xf32>
    %26 = arith.mulf %15, %25 : vector<64x32xf32>
    %27 = arith.addf %23, %26 : vector<64x32xf32>
    %cst_13 = arith.constant 0.000000e+00 : f32
    %28 = vector.broadcast %cst_13 : f32 to vector<64x32xf32>
    %29 = arith.cmpf ogt, %27, %28 : vector<64x32xf32>
    %cst_14 = arith.constant 0.000000e+00 : f32
    %30 = vector.broadcast %cst_14 : f32 to vector<64x32xf32>
    %31 = arith.maximumf %27, %30 : vector<64x32xf32>
    %32 = tpu.concatenate %31, %2 in 1 : vector<64x32xf32>, vector<64x1xf32> -> vector<64x33xf32>
    %cst_15 = arith.constant dense<0.000000e+00> : vector<3x64xf32>
    %33 = tpu.matmul %1, %32, %cst_15 {dimension_numbers = #tpu.dot_dimension_numbers<[1], [1], [0], [0], [0, 0, 1, 0], [], []>} : vector<3x33xf32>, vector<64x33xf32>, vector<3x64xf32> -> vector<3x64xf32>
    %c0_16 = arith.constant 0 : index
    %c0_17 = arith.constant 0 : index
    %c0_18 = arith.constant 0 : index
    %c0_19 = arith.constant 0 : index
    %34 = vector.load %arg7[%c0_16, %c0_17, %c0_18, %c0_19] : memref<2x3x3x64xf32, #tpu.memory_space<vmem>>, vector<1x1x3x64xf32>
    %35 = vector.shape_cast %34 : vector<1x1x3x64xf32> to vector<3x64xf32>
    %36 = vector.shape_cast %33 : vector<3x64xf32> to vector<1x1x3x64xf32>
    tpu.vector_store %arg7[%c0_16, %c0_17, %c0_18, %c0_19], %36 {strides = array<i32>} : memref<2x3x3x64xf32, #tpu.memory_space<vmem>>, vector<1x1x3x64xf32>,
    %37 = arith.subf %33, %7 : vector<3x64xf32>
    %cst_20 = arith.constant dense<0.000000e+00> : vector<3x33xf32>
    %38 = tpu.matmul %37, %32, %cst_20 {dimension_numbers = #tpu.dot_dimension_numbers<[1], [0], [0], [1], [0, 0, 1, 1], [], []>} : vector<3x64xf32>, vector<64x33xf32>, vector<3x33xf32> -> vector<3x33xf32>
    %39 = vector.extract_strided_slice %1 {offsets = [0, 0], sizes = [3, 32], strides = [1, 1]} : vector<3x33xf32> to vector<3x32xf32>
    %cst_21 = arith.constant dense<0.000000e+00> : vector<64x32xf32>
    %40 = tpu.matmul %37, %39, %cst_21 {dimension_numbers = #tpu.dot_dimension_numbers<[0], [0], [1], [1], [0, 1, 1, 1], [], []>} : vector<3x64xf32>, vector<3x32xf32>, vector<64x32xf32> -> vector<64x32xf32>
    %cst_22 = arith.constant 0.000000e+00 : f32
    %41 = vector.broadcast %cst_22 : f32 to vector<64x32xf32>
    %42 = arith.select %29, %40, %41 : vector<64x32xi1>, vector<64x32xf32>
    %cst_23 = arith.constant dense<0.000000e+00> : vector<3x32xf32>
    %43 = tpu.matmul %16, %42, %cst_23 {dimension_numbers = #tpu.dot_dimension_numbers<[0], [0], [1], [1], [0, 1, 1, 1], [], []>} : vector<64x3xf32>, vector<64x32xf32>, vector<3x32xf32> -> vector<3x32xf32>
    %cst_24 = arith.constant 5.20833346E-5 : f32
    %44 = vector.broadcast %cst_24 : f32 to vector<3x32xf32>
    %45 = arith.mulf %44, %43 : vector<3x32xf32>
    %46 = arith.subf %0, %45 : vector<3x32xf32>
    %cst_25 = arith.constant 5.20833346E-5 : f32
    %47 = vector.broadcast %cst_25 : f32 to vector<3x33xf32>
    %48 = arith.mulf %47, %38 : vector<3x33xf32>
    %49 = arith.subf %1, %48 : vector<3x33xf32>
    %50 = vector.extract_strided_slice %46 {offsets = [2, 0], sizes = [1, 32], strides = [1, 1]} : vector<3x32xf32> to vector<1x32xf32>
    %51 = vector.shape_cast %50 : vector<1x32xf32> to vector<1x32xf32>
    %52 = vector.broadcast %51 : vector<1x32xf32> to vector<64x32xf32>
    %53 = vector.extract_strided_slice %46 {offsets = [0, 0], sizes = [1, 32], strides = [1, 1]} : vector<3x32xf32> to vector<1x32xf32>
    %54 = vector.broadcast %53 : vector<1x32xf32> to vector<64x32xf32>
    %55 = arith.mulf %12, %54 : vector<64x32xf32>
    %56 = arith.addf %52, %55 : vector<64x32xf32>
    %57 = vector.extract_strided_slice %46 {offsets = [1, 0], sizes = [1, 32], strides = [1, 1]} : vector<3x32xf32> to vector<1x32xf32>
    %58 = vector.broadcast %57 : vector<1x32xf32> to vector<64x32xf32>
    %59 = arith.mulf %15, %58 : vector<64x32xf32>
    %60 = arith.addf %56, %59 : vector<64x32xf32>
    %cst_26 = arith.constant 0.000000e+00 : f32
    %61 = vector.broadcast %cst_26 : f32 to vector<64x32xf32>
    %62 = arith.cmpf ogt, %60, %61 : vector<64x32xf32>
    %cst_27 = arith.constant 0.000000e+00 : f32
    %63 = vector.broadcast %cst_27 : f32 to vector<64x32xf32>
    %64 = arith.maximumf %60, %63 : vector<64x32xf32>
    %65 = tpu.concatenate %64, %2 in 1 : vector<64x32xf32>, vector<64x1xf32> -> vector<64x33xf32>
    %cst_28 = arith.constant dense<0.000000e+00> : vector<3x64xf32>
    %66 = tpu.matmul %49, %65, %cst_28 {dimension_numbers = #tpu.dot_dimension_numbers<[1], [1], [0], [0], [0, 0, 1, 0], [], []>} : vector<3x33xf32>, vector<64x33xf32>, vector<3x64xf32> -> vector<3x64xf32>
    %c0_29 = arith.constant 0 : index
    %c1 = arith.constant 1 : index
    %c0_30 = arith.constant 0 : index
    %c0_31 = arith.constant 0 : index
    %67 = vector.load %arg7[%c0_29, %c1, %c0_30, %c0_31] : memref<2x3x3x64xf32, #tpu.memory_space<vmem>>, vector<1x1x3x64xf32>
    %68 = vector.shape_cast %67 : vector<1x1x3x64xf32> to vector<3x64xf32>
    %69 = vector.shape_cast %66 : vector<3x64xf32> to vector<1x1x3x64xf32>
    tpu.vector_store %arg7[%c0_29, %c1, %c0_30, %c0_31], %69 {strides = array<i32>} : memref<2x3x3x64xf32, #tpu.memory_space<vmem>>, vector<1x1x3x64xf32>,
    %70 = arith.subf %66, %7 : vector<3x64xf32>
    %cst_32 = arith.constant dense<0.000000e+00> : vector<3x33xf32>
    %71 = tpu.matmul %70, %65, %cst_32 {dimension_numbers = #tpu.dot_dimension_numbers<[1], [0], [0], [1], [0, 0, 1, 1], [], []>} : vector<3x64xf32>, vector<64x33xf32>, vector<3x33xf32> -> vector<3x33xf32>
    %72 = vector.extract_strided_slice %49 {offsets = [0, 0], sizes = [3, 32], strides = [1, 1]} : vector<3x33xf32> to vector<3x32xf32>
    %cst_33 = arith.constant dense<0.000000e+00> : vector<64x32xf32>
    %73 = tpu.matmul %70, %72, %cst_33 {dimension_numbers = #tpu.dot_dimension_numbers<[0], [0], [1], [1], [0, 1, 1, 1], [], []>} : vector<3x64xf32>, vector<3x32xf32>, vector<64x32xf32> -> vector<64x32xf32>
    %cst_34 = arith.constant 0.000000e+00 : f32
    %74 = vector.broadcast %cst_34 : f32 to vector<64x32xf32>
    %75 = arith.select %62, %73, %74 : vector<64x32xi1>, vector<64x32xf32>
    %cst_35 = arith.constant dense<0.000000e+00> : vector<3x32xf32>
    %76 = tpu.matmul %16, %75, %cst_35 {dimension_numbers = #tpu.dot_dimension_numbers<[0], [0], [1], [1], [0, 1, 1, 1], [], []>} : vector<64x3xf32>, vector<64x32xf32>, vector<3x32xf32> -> vector<3x32xf32>
    %cst_36 = arith.constant 5.20833346E-5 : f32
    %77 = vector.broadcast %cst_36 : f32 to vector<3x32xf32>
    %78 = arith.mulf %77, %76 : vector<3x32xf32>
    %79 = arith.subf %46, %78 : vector<3x32xf32>
    %cst_37 = arith.constant 5.20833346E-5 : f32
    %80 = vector.broadcast %cst_37 : f32 to vector<3x33xf32>
    %81 = arith.mulf %80, %71 : vector<3x33xf32>
    %82 = arith.subf %49, %81 : vector<3x33xf32>
    %83 = vector.extract_strided_slice %79 {offsets = [2, 0], sizes = [1, 32], strides = [1, 1]} : vector<3x32xf32> to vector<1x32xf32>
    %84 = vector.shape_cast %83 : vector<1x32xf32> to vector<1x32xf32>
    %85 = vector.broadcast %84 : vector<1x32xf32> to vector<64x32xf32>
    %86 = vector.extract_strided_slice %79 {offsets = [0, 0], sizes = [1, 32], strides = [1, 1]} : vector<3x32xf32> to vector<1x32xf32>
    %87 = vector.broadcast %86 : vector<1x32xf32> to vector<64x32xf32>
    %88 = arith.mulf %12, %87 : vector<64x32xf32>
    %89 = arith.addf %85, %88 : vector<64x32xf32>
    %90 = vector.extract_strided_slice %79 {offsets = [1, 0], sizes = [1, 32], strides = [1, 1]} : vector<3x32xf32> to vector<1x32xf32>
    %91 = vector.broadcast %90 : vector<1x32xf32> to vector<64x32xf32>
    %92 = arith.mulf %15, %91 : vector<64x32xf32>
    %93 = arith.addf %89, %92 : vector<64x32xf32>
    %cst_38 = arith.constant 0.000000e+00 : f32
    %94 = vector.broadcast %cst_38 : f32 to vector<64x32xf32>
    %95 = arith.cmpf ogt, %93, %94 : vector<64x32xf32>
    %cst_39 = arith.constant 0.000000e+00 : f32
    %96 = vector.broadcast %cst_39 : f32 to vector<64x32xf32>
    %97 = arith.maximumf %93, %96 : vector<64x32xf32>
    %98 = tpu.concatenate %97, %2 in 1 : vector<64x32xf32>, vector<64x1xf32> -> vector<64x33xf32>
    %cst_40 = arith.constant dense<0.000000e+00> : vector<3x64xf32>
    %99 = tpu.matmul %82, %98, %cst_40 {dimension_numbers = #tpu.dot_dimension_numbers<[1], [1], [0], [0], [0, 0, 1, 0], [], []>} : vector<3x33xf32>, vector<64x33xf32>, vector<3x64xf32> -> vector<3x64xf32>
    %c0_41 = arith.constant 0 : index
    %c2 = arith.constant 2 : index
    %c0_42 = arith.constant 0 : index
    %c0_43 = arith.constant 0 : index
    %100 = vector.load %arg7[%c0_41, %c2, %c0_42, %c0_43] : memref<2x3x3x64xf32, #tpu.memory_space<vmem>>, vector<1x1x3x64xf32>
    %101 = vector.shape_cast %100 : vector<1x1x3x64xf32> to vector<3x64xf32>
    %102 = vector.shape_cast %99 : vector<3x64xf32> to vector<1x1x3x64xf32>
    tpu.vector_store %arg7[%c0_41, %c2, %c0_42, %c0_43], %102 {strides = array<i32>} : memref<2x3x3x64xf32, #tpu.memory_space<vmem>>, vector<1x1x3x64xf32>,
    %103 = arith.subf %99, %7 : vector<3x64xf32>
    %cst_44 = arith.constant dense<0.000000e+00> : vector<3x33xf32>
    %104 = tpu.matmul %103, %98, %cst_44 {dimension_numbers = #tpu.dot_dimension_numbers<[1], [0], [0], [1], [0, 0, 1, 1], [], []>} : vector<3x64xf32>, vector<64x33xf32>, vector<3x33xf32> -> vector<3x33xf32>
    %105 = vector.extract_strided_slice %82 {offsets = [0, 0], sizes = [3, 32], strides = [1, 1]} : vector<3x33xf32> to vector<3x32xf32>
    %cst_45 = arith.constant dense<0.000000e+00> : vector<64x32xf32>
    %106 = tpu.matmul %103, %105, %cst_45 {dimension_numbers = #tpu.dot_dimension_numbers<[0], [0], [1], [1], [0, 1, 1, 1], [], []>} : vector<3x64xf32>, vector<3x32xf32>, vector<64x32xf32> -> vector<64x32xf32>
    %cst_46 = arith.constant 0.000000e+00 : f32
    %107 = vector.broadcast %cst_46 : f32 to vector<64x32xf32>
    %108 = arith.select %95, %106, %107 : vector<64x32xi1>, vector<64x32xf32>
    %cst_47 = arith.constant dense<0.000000e+00> : vector<3x32xf32>
    %109 = tpu.matmul %16, %108, %cst_47 {dimension_numbers = #tpu.dot_dimension_numbers<[0], [0], [1], [1], [0, 1, 1, 1], [], []>} : vector<64x3xf32>, vector<64x32xf32>, vector<3x32xf32> -> vector<3x32xf32>
    %cst_48 = arith.constant 5.20833346E-5 : f32
    %110 = vector.broadcast %cst_48 : f32 to vector<3x32xf32>
    %111 = arith.mulf %110, %109 : vector<3x32xf32>
    %112 = arith.subf %79, %111 : vector<3x32xf32>
    %cst_49 = arith.constant 5.20833346E-5 : f32
    %113 = vector.broadcast %cst_49 : f32 to vector<3x33xf32>
    %114 = arith.mulf %113, %104 : vector<3x33xf32>
    %115 = arith.subf %82, %114 : vector<3x33xf32>
    %116 = vector.extract_strided_slice %112 {offsets = [2, 0], sizes = [1, 32], strides = [1, 1]} : vector<3x32xf32> to vector<1x32xf32>
    %117 = vector.shape_cast %116 : vector<1x32xf32> to vector<1x32xf32>
    %118 = vector.broadcast %117 : vector<1x32xf32> to vector<64x32xf32>
    %119 = vector.extract_strided_slice %9 {offsets = [0, 0], sizes = [64, 1], strides = [1, 1]} : vector<64x2xf32> to vector<64x1xf32>
    %120 = vector.shape_cast %119 : vector<64x1xf32> to vector<64x1xf32>
    %121 = vector.broadcast %120 : vector<64x1xf32> to vector<64x32xf32>
    %122 = vector.extract_strided_slice %112 {offsets = [0, 0], sizes = [1, 32], strides = [1, 1]} : vector<3x32xf32> to vector<1x32xf32>
    %123 = vector.broadcast %122 : vector<1x32xf32> to vector<64x32xf32>
    %124 = arith.mulf %121, %123 : vector<64x32xf32>
    %125 = arith.addf %118, %124 : vector<64x32xf32>
    %126 = vector.extract_strided_slice %9 {offsets = [0, 1], sizes = [64, 1], strides = [1, 1]} : vector<64x2xf32> to vector<64x1xf32>
    %127 = vector.shape_cast %126 : vector<64x1xf32> to vector<64x1xf32>
    %128 = vector.broadcast %127 : vector<64x1xf32> to vector<64x32xf32>
    %129 = vector.extract_strided_slice %112 {offsets = [1, 0], sizes = [1, 32], strides = [1, 1]} : vector<3x32xf32> to vector<1x32xf32>
    %130 = vector.broadcast %129 : vector<1x32xf32> to vector<64x32xf32>
    %131 = arith.mulf %128, %130 : vector<64x32xf32>
    %132 = arith.addf %125, %131 : vector<64x32xf32>
    %cst_50 = arith.constant 0.000000e+00 : f32
    %133 = vector.broadcast %cst_50 : f32 to vector<64x32xf32>
    %134 = arith.maximumf %132, %133 : vector<64x32xf32>
    %135 = tpu.concatenate %134, %3 in 1 : vector<64x32xf32>, vector<64x1xf32> -> vector<64x33xf32>
    %cst_51 = arith.constant dense<0.000000e+00> : vector<3x64xf32>
    %136 = tpu.matmul %115, %135, %cst_51 {dimension_numbers = #tpu.dot_dimension_numbers<[1], [1], [0], [0], [0, 0, 1, 0], [], []>} : vector<3x33xf32>, vector<64x33xf32>, vector<3x64xf32> -> vector<3x64xf32>
    %c0_52 = arith.constant 0 : index
    %c0_53 = arith.constant 0 : index
    %c0_54 = arith.constant 0 : index
    %137 = vector.load %arg6[%c0_52, %c0_53, %c0_54] : memref<2x3x64xf32, #tpu.memory_space<vmem>>, vector<1x3x64xf32>
    %138 = vector.shape_cast %137 : vector<1x3x64xf32> to vector<3x64xf32>
    %139 = vector.shape_cast %136 : vector<3x64xf32> to vector<1x3x64xf32>
    tpu.vector_store %arg6[%c0_52, %c0_53, %c0_54], %139 {strides = array<i32>} : memref<2x3x64xf32, #tpu.memory_space<vmem>>, vector<1x3x64xf32>,
    %c1_55 = arith.constant 1 : index
    %c0_56 = arith.constant 0 : index
    %c0_57 = arith.constant 0 : index
    %140 = vector.load %arg1[%c1_55, %c0_56, %c0_57] : memref<2x64x2xf32, #tpu.memory_space<vmem>>, vector<1x64x2xf32>
    %141 = vector.shape_cast %140 : vector<1x64x2xf32> to vector<64x2xf32>
    %c1_58 = arith.constant 1 : index
    %c0_59 = arith.constant 0 : index
    %c0_60 = arith.constant 0 : index
    %142 = vector.load %arg2[%c1_58, %c0_59, %c0_60] : memref<2x3x64xf32, #tpu.memory_space<vmem>>, vector<1x3x64xf32>
    %143 = vector.shape_cast %142 : vector<1x3x64xf32> to vector<3x64xf32>
    %c1_61 = arith.constant 1 : index
    %c0_62 = arith.constant 0 : index
    %c0_63 = arith.constant 0 : index
    %144 = vector.load %arg3[%c1_61, %c0_62, %c0_63] : memref<2x64x2xf32, #tpu.memory_space<vmem>>, vector<1x64x2xf32>
    %145 = vector.shape_cast %144 : vector<1x64x2xf32> to vector<64x2xf32>
    %146 = vector.extract_strided_slice %141 {offsets = [0, 0], sizes = [64, 1], strides = [1, 1]} : vector<64x2xf32> to vector<64x1xf32>
    %147 = vector.shape_cast %146 : vector<64x1xf32> to vector<64x1xf32>
    %148 = vector.broadcast %147 : vector<64x1xf32> to vector<64x32xf32>
    %149 = vector.extract_strided_slice %141 {offsets = [0, 1], sizes = [64, 1], strides = [1, 1]} : vector<64x2xf32> to vector<64x1xf32>
    %150 = vector.shape_cast %149 : vector<64x1xf32> to vector<64x1xf32>
    %151 = vector.broadcast %150 : vector<64x1xf32> to vector<64x32xf32>
    %152 = tpu.concatenate %141, %2 in 1 : vector<64x2xf32>, vector<64x1xf32> -> vector<64x3xf32>
    %153 = vector.extract_strided_slice %0 {offsets = [2, 0], sizes = [1, 32], strides = [1, 1]} : vector<3x32xf32> to vector<1x32xf32>
    %154 = vector.shape_cast %153 : vector<1x32xf32> to vector<1x32xf32>
    %155 = vector.broadcast %154 : vector<1x32xf32> to vector<64x32xf32>
    %156 = vector.extract_strided_slice %0 {offsets = [0, 0], sizes = [1, 32], strides = [1, 1]} : vector<3x32xf32> to vector<1x32xf32>
    %157 = vector.broadcast %156 : vector<1x32xf32> to vector<64x32xf32>
    %158 = arith.mulf %148, %157 : vector<64x32xf32>
    %159 = arith.addf %155, %158 : vector<64x32xf32>
    %160 = vector.extract_strided_slice %0 {offsets = [1, 0], sizes = [1, 32], strides = [1, 1]} : vector<3x32xf32> to vector<1x32xf32>
    %161 = vector.broadcast %160 : vector<1x32xf32> to vector<64x32xf32>
    %162 = arith.mulf %151, %161 : vector<64x32xf32>
    %163 = arith.addf %159, %162 : vector<64x32xf32>
    %cst_64 = arith.constant 0.000000e+00 : f32
    %164 = vector.broadcast %cst_64 : f32 to vector<64x32xf32>
    %165 = arith.cmpf ogt, %163, %164 : vector<64x32xf32>
    %cst_65 = arith.constant 0.000000e+00 : f32
    %166 = vector.broadcast %cst_65 : f32 to vector<64x32xf32>
    %167 = arith.maximumf %163, %166 : vector<64x32xf32>
    %168 = tpu.concatenate %167, %2 in 1 : vector<64x32xf32>, vector<64x1xf32> -> vector<64x33xf32>
    %cst_66 = arith.constant dense<0.000000e+00> : vector<3x64xf32>
    %169 = tpu.matmul %1, %168, %cst_66 {dimension_numbers = #tpu.dot_dimension_numbers<[1], [1], [0], [0], [0, 0, 1, 0], [], []>} : vector<3x33xf32>, vector<64x33xf32>, vector<3x64xf32> -> vector<3x64xf32>
    %c1_67 = arith.constant 1 : index
    %c0_68 = arith.constant 0 : index
    %c0_69 = arith.constant 0 : index
    %c0_70 = arith.constant 0 : index
    %170 = vector.load %arg7[%c1_67, %c0_68, %c0_69, %c0_70] : memref<2x3x3x64xf32, #tpu.memory_space<vmem>>, vector<1x1x3x64xf32>
    %171 = vector.shape_cast %170 : vector<1x1x3x64xf32> to vector<3x64xf32>
    %172 = vector.shape_cast %169 : vector<3x64xf32> to vector<1x1x3x64xf32>
    tpu.vector_store %arg7[%c1_67, %c0_68, %c0_69, %c0_70], %172 {strides = array<i32>} : memref<2x3x3x64xf32, #tpu.memory_space<vmem>>, vector<1x1x3x64xf32>,
    %173 = arith.subf %169, %143 : vector<3x64xf32>
    %cst_71 = arith.constant dense<0.000000e+00> : vector<3x33xf32>
    %174 = tpu.matmul %173, %168, %cst_71 {dimension_numbers = #tpu.dot_dimension_numbers<[1], [0], [0], [1], [0, 0, 1, 1], [], []>} : vector<3x64xf32>, vector<64x33xf32>, vector<3x33xf32> -> vector<3x33xf32>
    %175 = vector.extract_strided_slice %1 {offsets = [0, 0], sizes = [3, 32], strides = [1, 1]} : vector<3x33xf32> to vector<3x32xf32>
    %cst_72 = arith.constant dense<0.000000e+00> : vector<64x32xf32>
    %176 = tpu.matmul %173, %175, %cst_72 {dimension_numbers = #tpu.dot_dimension_numbers<[0], [0], [1], [1], [0, 1, 1, 1], [], []>} : vector<3x64xf32>, vector<3x32xf32>, vector<64x32xf32> -> vector<64x32xf32>
    %cst_73 = arith.constant 0.000000e+00 : f32
    %177 = vector.broadcast %cst_73 : f32 to vector<64x32xf32>
    %178 = arith.select %165, %176, %177 : vector<64x32xi1>, vector<64x32xf32>
    %cst_74 = arith.constant dense<0.000000e+00> : vector<3x32xf32>
    %179 = tpu.matmul %152, %178, %cst_74 {dimension_numbers = #tpu.dot_dimension_numbers<[0], [0], [1], [1], [0, 1, 1, 1], [], []>} : vector<64x3xf32>, vector<64x32xf32>, vector<3x32xf32> -> vector<3x32xf32>
    %cst_75 = arith.constant 5.20833346E-5 : f32
    %180 = vector.broadcast %cst_75 : f32 to vector<3x32xf32>
    %181 = arith.mulf %180, %179 : vector<3x32xf32>
    %182 = arith.subf %0, %181 : vector<3x32xf32>
    %cst_76 = arith.constant 5.20833346E-5 : f32
    %183 = vector.broadcast %cst_76 : f32 to vector<3x33xf32>
    %184 = arith.mulf %183, %174 : vector<3x33xf32>
    %185 = arith.subf %1, %184 : vector<3x33xf32>
    %186 = vector.extract_strided_slice %182 {offsets = [2, 0], sizes = [1, 32], strides = [1, 1]} : vector<3x32xf32> to vector<1x32xf32>
    %187 = vector.shape_cast %186 : vector<1x32xf32> to vector<1x32xf32>
    %188 = vector.broadcast %187 : vector<1x32xf32> to vector<64x32xf32>
    %189 = vector.extract_strided_slice %182 {offsets = [0, 0], sizes = [1, 32], strides = [1, 1]} : vector<3x32xf32> to vector<1x32xf32>
    %190 = vector.broadcast %189 : vector<1x32xf32> to vector<64x32xf32>
    %191 = arith.mulf %148, %190 : vector<64x32xf32>
    %192 = arith.addf %188, %191 : vector<64x32xf32>
    %193 = vector.extract_strided_slice %182 {offsets = [1, 0], sizes = [1, 32], strides = [1, 1]} : vector<3x32xf32> to vector<1x32xf32>
    %194 = vector.broadcast %193 : vector<1x32xf32> to vector<64x32xf32>
    %195 = arith.mulf %151, %194 : vector<64x32xf32>
    %196 = arith.addf %192, %195 : vector<64x32xf32>
    %cst_77 = arith.constant 0.000000e+00 : f32
    %197 = vector.broadcast %cst_77 : f32 to vector<64x32xf32>
    %198 = arith.cmpf ogt, %196, %197 : vector<64x32xf32>
    %cst_78 = arith.constant 0.000000e+00 : f32
    %199 = vector.broadcast %cst_78 : f32 to vector<64x32xf32>
    %200 = arith.maximumf %196, %199 : vector<64x32xf32>
    %201 = tpu.concatenate %200, %2 in 1 : vector<64x32xf32>, vector<64x1xf32> -> vector<64x33xf32>
    %cst_79 = arith.constant dense<0.000000e+00> : vector<3x64xf32>
    %202 = tpu.matmul %185, %201, %cst_79 {dimension_numbers = #tpu.dot_dimension_numbers<[1], [1], [0], [0], [0, 0, 1, 0], [], []>} : vector<3x33xf32>, vector<64x33xf32>, vector<3x64xf32> -> vector<3x64xf32>
    %c1_80 = arith.constant 1 : index
    %c1_81 = arith.constant 1 : index
    %c0_82 = arith.constant 0 : index
    %c0_83 = arith.constant 0 : index
    %203 = vector.load %arg7[%c1_80, %c1_81, %c0_82, %c0_83] : memref<2x3x3x64xf32, #tpu.memory_space<vmem>>, vector<1x1x3x64xf32>
    %204 = vector.shape_cast %203 : vector<1x1x3x64xf32> to vector<3x64xf32>
    %205 = vector.shape_cast %202 : vector<3x64xf32> to vector<1x1x3x64xf32>
    tpu.vector_store %arg7[%c1_80, %c1_81, %c0_82, %c0_83], %205 {strides = array<i32>} : memref<2x3x3x64xf32, #tpu.memory_space<vmem>>, vector<1x1x3x64xf32>,
    %206 = arith.subf %202, %143 : vector<3x64xf32>
    %cst_84 = arith.constant dense<0.000000e+00> : vector<3x33xf32>
    %207 = tpu.matmul %206, %201, %cst_84 {dimension_numbers = #tpu.dot_dimension_numbers<[1], [0], [0], [1], [0, 0, 1, 1], [], []>} : vector<3x64xf32>, vector<64x33xf32>, vector<3x33xf32> -> vector<3x33xf32>
    %208 = vector.extract_strided_slice %185 {offsets = [0, 0], sizes = [3, 32], strides = [1, 1]} : vector<3x33xf32> to vector<3x32xf32>
    %cst_85 = arith.constant dense<0.000000e+00> : vector<64x32xf32>
    %209 = tpu.matmul %206, %208, %cst_85 {dimension_numbers = #tpu.dot_dimension_numbers<[0], [0], [1], [1], [0, 1, 1, 1], [], []>} : vector<3x64xf32>, vector<3x32xf32>, vector<64x32xf32> -> vector<64x32xf32>
    %cst_86 = arith.constant 0.000000e+00 : f32
    %210 = vector.broadcast %cst_86 : f32 to vector<64x32xf32>
    %211 = arith.select %198, %209, %210 : vector<64x32xi1>, vector<64x32xf32>
    %cst_87 = arith.constant dense<0.000000e+00> : vector<3x32xf32>
    %212 = tpu.matmul %152, %211, %cst_87 {dimension_numbers = #tpu.dot_dimension_numbers<[0], [0], [1], [1], [0, 1, 1, 1], [], []>} : vector<64x3xf32>, vector<64x32xf32>, vector<3x32xf32> -> vector<3x32xf32>
    %cst_88 = arith.constant 5.20833346E-5 : f32
    %213 = vector.broadcast %cst_88 : f32 to vector<3x32xf32>
    %214 = arith.mulf %213, %212 : vector<3x32xf32>
    %215 = arith.subf %182, %214 : vector<3x32xf32>
    %cst_89 = arith.constant 5.20833346E-5 : f32
    %216 = vector.broadcast %cst_89 : f32 to vector<3x33xf32>
    %217 = arith.mulf %216, %207 : vector<3x33xf32>
    %218 = arith.subf %185, %217 : vector<3x33xf32>
    %219 = vector.extract_strided_slice %215 {offsets = [2, 0], sizes = [1, 32], strides = [1, 1]} : vector<3x32xf32> to vector<1x32xf32>
    %220 = vector.shape_cast %219 : vector<1x32xf32> to vector<1x32xf32>
    %221 = vector.broadcast %220 : vector<1x32xf32> to vector<64x32xf32>
    %222 = vector.extract_strided_slice %215 {offsets = [0, 0], sizes = [1, 32], strides = [1, 1]} : vector<3x32xf32> to vector<1x32xf32>
    %223 = vector.broadcast %222 : vector<1x32xf32> to vector<64x32xf32>
    %224 = arith.mulf %148, %223 : vector<64x32xf32>
    %225 = arith.addf %221, %224 : vector<64x32xf32>
    %226 = vector.extract_strided_slice %215 {offsets = [1, 0], sizes = [1, 32], strides = [1, 1]} : vector<3x32xf32> to vector<1x32xf32>
    %227 = vector.broadcast %226 : vector<1x32xf32> to vector<64x32xf32>
    %228 = arith.mulf %151, %227 : vector<64x32xf32>
    %229 = arith.addf %225, %228 : vector<64x32xf32>
    %cst_90 = arith.constant 0.000000e+00 : f32
    %230 = vector.broadcast %cst_90 : f32 to vector<64x32xf32>
    %231 = arith.cmpf ogt, %229, %230 : vector<64x32xf32>
    %cst_91 = arith.constant 0.000000e+00 : f32
    %232 = vector.broadcast %cst_91 : f32 to vector<64x32xf32>
    %233 = arith.maximumf %229, %232 : vector<64x32xf32>
    %234 = tpu.concatenate %233, %2 in 1 : vector<64x32xf32>, vector<64x1xf32> -> vector<64x33xf32>
    %cst_92 = arith.constant dense<0.000000e+00> : vector<3x64xf32>
    %235 = tpu.matmul %218, %234, %cst_92 {dimension_numbers = #tpu.dot_dimension_numbers<[1], [1], [0], [0], [0, 0, 1, 0], [], []>} : vector<3x33xf32>, vector<64x33xf32>, vector<3x64xf32> -> vector<3x64xf32>
    %c1_93 = arith.constant 1 : index
    %c2_94 = arith.constant 2 : index
    %c0_95 = arith.constant 0 : index
    %c0_96 = arith.constant 0 : index
    %236 = vector.load %arg7[%c1_93, %c2_94, %c0_95, %c0_96] : memref<2x3x3x64xf32, #tpu.memory_space<vmem>>, vector<1x1x3x64xf32>
    %237 = vector.shape_cast %236 : vector<1x1x3x64xf32> to vector<3x64xf32>
    %238 = vector.shape_cast %235 : vector<3x64xf32> to vector<1x1x3x64xf32>
    tpu.vector_store %arg7[%c1_93, %c2_94, %c0_95, %c0_96], %238 {strides = array<i32>} : memref<2x3x3x64xf32, #tpu.memory_space<vmem>>, vector<1x1x3x64xf32>,
    %239 = arith.subf %235, %143 : vector<3x64xf32>
    %cst_97 = arith.constant dense<0.000000e+00> : vector<3x33xf32>
    %240 = tpu.matmul %239, %234, %cst_97 {dimension_numbers = #tpu.dot_dimension_numbers<[1], [0], [0], [1], [0, 0, 1, 1], [], []>} : vector<3x64xf32>, vector<64x33xf32>, vector<3x33xf32> -> vector<3x33xf32>
    %241 = vector.extract_strided_slice %218 {offsets = [0, 0], sizes = [3, 32], strides = [1, 1]} : vector<3x33xf32> to vector<3x32xf32>
    %cst_98 = arith.constant dense<0.000000e+00> : vector<64x32xf32>
    %242 = tpu.matmul %239, %241, %cst_98 {dimension_numbers = #tpu.dot_dimension_numbers<[0], [0], [1], [1], [0, 1, 1, 1], [], []>} : vector<3x64xf32>, vector<3x32xf32>, vector<64x32xf32> -> vector<64x32xf32>
    %cst_99 = arith.constant 0.000000e+00 : f32
    %243 = vector.broadcast %cst_99 : f32 to vector<64x32xf32>
    %244 = arith.select %231, %242, %243 : vector<64x32xi1>, vector<64x32xf32>
    %cst_100 = arith.constant dense<0.000000e+00> : vector<3x32xf32>
    %245 = tpu.matmul %152, %244, %cst_100 {dimension_numbers = #tpu.dot_dimension_numbers<[0], [0], [1], [1], [0, 1, 1, 1], [], []>} : vector<64x3xf32>, vector<64x32xf32>, vector<3x32xf32> -> vector<3x32xf32>
    %cst_101 = arith.constant 5.20833346E-5 : f32
    %246 = vector.broadcast %cst_101 : f32 to vector<3x32xf32>
    %247 = arith.mulf %246, %245 : vector<3x32xf32>
    %248 = arith.subf %215, %247 : vector<3x32xf32>
    %cst_102 = arith.constant 5.20833346E-5 : f32
    %249 = vector.broadcast %cst_102 : f32 to vector<3x33xf32>
    %250 = arith.mulf %249, %240 : vector<3x33xf32>
    %251 = arith.subf %218, %250 : vector<3x33xf32>
    %252 = vector.extract_strided_slice %248 {offsets = [2, 0], sizes = [1, 32], strides = [1, 1]} : vector<3x32xf32> to vector<1x32xf32>
    %253 = vector.shape_cast %252 : vector<1x32xf32> to vector<1x32xf32>
    %254 = vector.broadcast %253 : vector<1x32xf32> to vector<64x32xf32>
    %255 = vector.extract_strided_slice %145 {offsets = [0, 0], sizes = [64, 1], strides = [1, 1]} : vector<64x2xf32> to vector<64x1xf32>
    %256 = vector.shape_cast %255 : vector<64x1xf32> to vector<64x1xf32>
    %257 = vector.broadcast %256 : vector<64x1xf32> to vector<64x32xf32>
    %258 = vector.extract_strided_slice %248 {offsets = [0, 0], sizes = [1, 32], strides = [1, 1]} : vector<3x32xf32> to vector<1x32xf32>
    %259 = vector.broadcast %258 : vector<1x32xf32> to vector<64x32xf32>
    %260 = arith.mulf %257, %259 : vector<64x32xf32>
    %261 = arith.addf %254, %260 : vector<64x32xf32>
    %262 = vector.extract_strided_slice %145 {offsets = [0, 1], sizes = [64, 1], strides = [1, 1]} : vector<64x2xf32> to vector<64x1xf32>
    %263 = vector.shape_cast %262 : vector<64x1xf32> to vector<64x1xf32>
    %264 = vector.broadcast %263 : vector<64x1xf32> to vector<64x32xf32>
    %265 = vector.extract_strided_slice %248 {offsets = [1, 0], sizes = [1, 32], strides = [1, 1]} : vector<3x32xf32> to vector<1x32xf32>
    %266 = vector.broadcast %265 : vector<1x32xf32> to vector<64x32xf32>
    %267 = arith.mulf %264, %266 : vector<64x32xf32>
    %268 = arith.addf %261, %267 : vector<64x32xf32>
    %cst_103 = arith.constant 0.000000e+00 : f32
    %269 = vector.broadcast %cst_103 : f32 to vector<64x32xf32>
    %270 = arith.maximumf %268, %269 : vector<64x32xf32>
    %271 = tpu.concatenate %270, %3 in 1 : vector<64x32xf32>, vector<64x1xf32> -> vector<64x33xf32>
    %cst_104 = arith.constant dense<0.000000e+00> : vector<3x64xf32>
    %272 = tpu.matmul %251, %271, %cst_104 {dimension_numbers = #tpu.dot_dimension_numbers<[1], [1], [0], [0], [0, 0, 1, 0], [], []>} : vector<3x33xf32>, vector<64x33xf32>, vector<3x64xf32> -> vector<3x64xf32>
    %c1_105 = arith.constant 1 : index
    %c0_106 = arith.constant 0 : index
    %c0_107 = arith.constant 0 : index
    %273 = vector.load %arg6[%c1_105, %c0_106, %c0_107] : memref<2x3x64xf32, #tpu.memory_space<vmem>>, vector<1x3x64xf32>
    %274 = vector.shape_cast %273 : vector<1x3x64xf32> to vector<3x64xf32>
    %275 = vector.shape_cast %272 : vector<3x64xf32> to vector<1x3x64xf32>
    tpu.vector_store %arg6[%c1_105, %c0_106, %c0_107], %275 {strides = array<i32>} : memref<2x3x64xf32, #tpu.memory_space<vmem>>, vector<1x3x64xf32>,
    return
  }
  func.func @transform_0(%arg0: i32) -> (i32, i32, i32) {
    %c0_i32 = arith.constant 0 : i32
    %c0_i32_0 = arith.constant 0 : i32
    %c0_i32_1 = arith.constant 0 : i32
    return %arg0, %c0_i32, %c0_i32_0 : i32, i32, i32
  }
  func.func @transform_1(%arg0: i32) -> (i32, i32, i32) {
    %c0_i32 = arith.constant 0 : i32
    %c0_i32_0 = arith.constant 0 : i32
    %c0_i32_1 = arith.constant 0 : i32
    return %arg0, %c0_i32, %c0_i32_0 : i32, i32, i32
  }
  func.func @transform_2(%arg0: i32) -> (i32, i32, i32) {
    %c0_i32 = arith.constant 0 : i32
    %c0_i32_0 = arith.constant 0 : i32
    %c0_i32_1 = arith.constant 0 : i32
    return %arg0, %c0_i32, %c0_i32_0 : i32, i32, i32
  }
  func.func @transform_3(%arg0: i32) -> (i32, i32) {
    %c0_i32 = arith.constant 0 : i32
    %c0_i32_0 = arith.constant 0 : i32
    %c0_i32_1 = arith.constant 0 : i32
    return %c0_i32, %c0_i32_0 : i32, i32
  }
  func.func @transform_4(%arg0: i32) -> (i32, i32) {
    %c0_i32 = arith.constant 0 : i32
    %c0_i32_0 = arith.constant 0 : i32
    %c0_i32_1 = arith.constant 0 : i32
    return %c0_i32, %c0_i32_0 : i32, i32
  }
  func.func @transform_5(%arg0: i32) -> (i32, i32, i32) {
    %c0_i32 = arith.constant 0 : i32
    %c0_i32_0 = arith.constant 0 : i32
    %c0_i32_1 = arith.constant 0 : i32
    return %arg0, %c0_i32, %c0_i32_0 : i32, i32, i32
  }
  func.func @transform_6(%arg0: i32) -> (i32, i32, i32, i32) {
    %c0_i32 = arith.constant 0 : i32
    %c0_i32_0 = arith.constant 0 : i32
    %c0_i32_1 = arith.constant 0 : i32
    %c0_i32_2 = arith.constant 0 : i32
    return %arg0, %c0_i32, %c0_i32_0, %c0_i32_1 : i32, i32, i32, i32
  }
}

</mosaic_0001>

<bundles_post_ra>
// kernel: tpu_custom_call.1
= control target key start
LH: loop header
LB: loop body
LE: loop exit
PB: predicated region body
PF: predicated region fallthrough
CT: control target
= control target key end

     0   :  { %v3490_v0 = vmov 0   ;;  %v3492_v4 = vmov 1   ;;  %vm113_vm0 = vcmask 15360   ;;  %vm182_vm1 = vcmask 269312   ;;  %s3483_s0 = inlined_call_operand.vmem [shape: f32[2,64,2], index: 0, kind: input, shape index: {}]   ;;  %s3484_s3 = inlined_call_operand.vmem [shape: f32[3,32], index: 3, kind: input, shape index: {}]   ;;  %s3485_s4 = inlined_call_operand.vmem [shape: f32[3,33], index: 4, kind: input, shape index: {}]   ;;  %s3486_s1 = inlined_call_operand.vmem [shape: f32[2,3,64], index: 1, kind: input, shape index: {}]   ;;  %s3487_s6 = inlined_call_operand.vmem [shape: f32[2,3,3,64], index: 6, kind: output, shape index: {1}]   ;;  %s3488_s2 = inlined_call_operand.vmem [shape: f32[2,64,2], index: 2, kind: input, shape index: {}]   ;;  %s3489_s5 = inlined_call_operand.vmem [shape: f32[2,3,64], index: 5, kind: output, shape index: {0}]  }
   0x1   :  { %2435 = vset.pattern.permute.xlu2 %v3490_v0  ;;  %2433 = vset.pattern.permute.xlu1 %v3490_v0  ;;  %v2511_v1 = vld [vmem:[%s3483_s0 + $0x38] sm:$0xff]  ;;  %v2516_v2 = vld [vmem:[%s3483_s0 + $0x30] sm:$0xff]  ;;  %v29_v3 = vld [vmem:[%s3483_s0 + $0x28] sm:$0xff]  ;;  %vm173_vm2 = vcmask 261120   ;;  %vm230_vm3 = vcmask 518144   ;;  %vm233_vm4 = vcmask 523264  }
   0x2   :  { %2431 = vset.pattern.permute.xlu0 %v3490_v0  ;;  %73 = vperm.xlu1 %2433, %v2516_v2   ;;  %v28_v5 = vld [vmem:[%s3483_s0 + $0x20] sm:$0xff]  ;;  %v27_v6 = vld [vmem:[%s3483_s0 + $0x18] sm:$0xff]  ;;  %v26_v7 = vld [vmem:[%s3483_s0 + $0x10] sm:$0xff]  ;;  %v119_v24 = vsel %vm113_vm0, %v29_v3, 1.0  ;;  %v120_v39 = vsel %vm113_vm0, %v2516_v2, 1.0  ;;  %v121_v52 = vsel %vm113_vm0, %v2511_v1, 1.0 }
   0x3   :  { %78 = vperm.xlu0 %2431, %v2511_v1   ;;  %68 = vperm.xlu2 %2435, %v29_v3   ;;  %v25_v8 = vld [vmem:[%s3483_s0 + $0x8] sm:$0xff]  ;;  %v24_v9 = vld [vmem:[%s3483_s0] sm:$0xff]  ;;  %v116_v12 = vsel %vm113_vm0, %v26_v7, 1.0  ;;  %v117_v14 = vsel %vm113_vm0, %v27_v6, 1.0  ;;  %v118_v16 = vsel %vm113_vm0, %v28_v5, 1.0  ;;  %vm314_vm5 = vcmask 1042432  }
   0x4   :  { %v114_v10 = vsel %vm113_vm0, %v24_v9, 1.0  ;;  %v115_v11 = vsel %vm113_vm0, %v25_v8, 1.0  ;;  %v2563_v17 = vld [vmem:[%s3484_s3] sm:$0x7]  ;;  %vm289_vm6 = vcmask 23552  }
   0x5   :  { %v2570_v20 = vperm.slane %v2563_v17, 0  ;;  %v2577_v23 = vperm.slane %v2563_v17, 1  ;;  %v2583_v26 = vperm.slane %v2563_v17, 2 }
   0xa   :  { %2434 = vset.pattern.permute.xlu1 %v3492_v4 }
   0xb   :  { %2432 = vset.pattern.permute.xlu0 %v3492_v4  ;;  %2436 = vset.pattern.permute.xlu2 %v3492_v4 }
   0xc   :  { %110 = vperm.xlu0 %2432, %v2511_v1   ;;  %106 = vperm.xlu1 %2434, %v2516_v2  }
   0xd   :  { %102 = vperm.xlu2 %2436, %v29_v3  }
  0x14   :  { %2437 = vset.pattern.permute.xlu1 %v3490_v0  ;;  %2438 = vset.pattern.permute.xlu0 %v3490_v0 }
  0x15   :  { %98 = vperm.xlu2 %2436, %v28_v5   ;;  %63 = vperm.xlu1 %2437, %v28_v5  }
  0x16   :  { %58 = vperm.xlu0 %2438, %v27_v6  }
  0x1d   :  { %2440 = vset.pattern.permute.xlu2 %v3490_v0  ;;  %2439 = vset.pattern.permute.xlu1 %v3492_v4 }
  0x1e   :  { %53 = vperm.xlu2 %2440, %v26_v7   ;;  %94 = vperm.xlu1 %2439, %v27_v6  }
  0x1f   :  { %2441 = vset.pattern.permute.xlu0 %v3492_v4 }
  0x20   :  { %86 = vperm.xlu0 %2441, %v25_v8  }
  0x26   :  { %48 = vperm.xlu2 %2440, %v25_v8   ;;  %90 = vperm.xlu1 %2439, %v26_v7  }
  0x2e   :  { %2443 = vset.pattern.permute.xlu2 %v3492_v4  ;;  %2442 = vset.pattern.permute.xlu1 %v3490_v0 }
  0x2f   :  { %82 = vperm.xlu2 %2443, %v24_v9   ;;  %43 = vperm.xlu1 %2442, %v24_v9  }
  0x55   :  { %366 = vxpose.xlu2.b32.start [1/8] (short) (narrow) %v114_v10, 8 }
  0x5d   :  { %367 = vxpose.xlu2.b32.cont [2/8] (short) (narrow) %v115_v11, 8  ;;  %v2554_v13 = vpop.permute.xlu2 %68 }
  0x5e   :  { %v129_v21 = vmul.f32 %v2570_v20, %v2554_v13 }
  0x60   :  { %v137_v28 = vadd.f32 %v129_v21, %v2583_v26 }
  0x65   :  { %368 = vxpose.xlu2.b32.cont [3/8] (short) (narrow) %v116_v12, 8 }
  0x67   :  { %v2557_v15 = vpop.permute.xlu2 %102 }
  0x68   :  { %v146_v30 = vmul.f32 %v2577_v23, %v2557_v15 }
  0x6a   :  { %v2604_v38 = vadd.f32 %v146_v30, %v137_v28 }
  0x6c   :  { %v170_v44 = vmax.f32 %v2604_v38, 0.0  ;;  %vm162_vm9 = vcmp.gt.f32.partialorder %v2604_v38, 0.0 }
  0x6d   :  { %369 = vxpose.xlu2.b32.cont [4/8] (short) (narrow) %v117_v14, 8 }
  0x6e   :  { %v179_v49 = vsel %vm173_vm2, %v170_v44, 1.0 }
  0x6f   :  { %v2580_v25 = vpop.permute.xlu2 %98 }
  0x70   :  { %v145_v50 = vmul.f32 %v2577_v23, %v2580_v25 }
  0x74   :  { %v2565_v18 = vpop.permute.xlu1 %73 }
  0x75   :  { %370 = vxpose.xlu2.b32.cont [5/8] (short) (narrow) %v118_v16, 8  ;;  %v2567_v19 = vpop.permute.xlu0 %78  ;;  %v130_v27 = vmul.f32 %v2570_v20, %v2565_v18 }
  0x76   :  { %v131_v22 = vmul.f32 %v2570_v20, %v2567_v19 }
  0x77   :  { %v138_v33 = vadd.f32 %v130_v27, %v2583_v26 }
  0x78   :  { %v139_v29 = vadd.f32 %v131_v22, %v2583_v26  ;;  %v2610_v42 = vpop.permute.xlu2 %53 }
  0x79   :  { %v126_v1 = vmul.f32 %v2570_v20, %v2610_v42 }
  0x7b   :  { %v134_v8 = vadd.f32 %v126_v1, %v2583_v26 }
  0x7d   :  { %371 = vxpose.xlu2.b32.cont [6/8] (short) (narrow) %v119_v24, 8 }
  0x7e   :  { %v2591_v31 = vpop.permute.xlu0 %110  ;;  %v2593_v32 = vpop.permute.xlu1 %106 }
  0x7f   :  { %v148_v34 = vmul.f32 %v2577_v23, %v2591_v31  ;;  %v147_v35 = vmul.f32 %v2577_v23, %v2593_v32 }
  0x80   :  { %v2635_v56 = vpop.permute.xlu2 %48 }
  0x81   :  { %v2600_v36 = vadd.f32 %v148_v34, %v139_v29  ;;  %v2602_v37 = vadd.f32 %v147_v35, %v138_v33  ;;  %v125_v61 = vmul.f32 %v2570_v20, %v2635_v56  ;;  %v2690_v35 = vld [vmem:[%s3485_s4] sm:$0x7] }
  0x82   :  { %2228 = vmatpush.msk.msra.mxu2 %vm314_vm5, %v2690_v35 }
  0x83   :  { %v172_v40 = vmax.f32 %v2600_v36, 0.0  ;;  %v171_v41 = vmax.f32 %v2602_v37, 0.0  ;;  %v133_v2 = vadd.f32 %v125_v61, %v2583_v26  ;;  %vm164_vm7 = vcmp.gt.f32.partialorder %v2600_v36, 0.0 }
  0x84   :  { %vm163_vm8 = vcmp.gt.f32.partialorder %v2602_v37, 0.0 }
  0x85   :  { %372 = vxpose.xlu2.b32.cont [7/8] (short) (narrow) %v120_v39, 8  ;;  %v181_v43 = vsel %vm173_vm2, %v172_v40, 1.0  ;;  %v180_v46 = vsel %vm173_vm2, %v171_v41, 1.0  ;;  %v2320_v39 = vld [vmem:[%s3483_s0 + $0x78] sm:$0xff]  ;;  %v2701_v40 = vld [vmem:[%s3486_s1] sm:$0x7] }
  0x86   :  { %2218 = vmatpush.xpose.msk.msra.mxu0 %vm182_vm1, %v181_v43  ;;  %245 = vmatpush.msra.mxu1 %v181_v43 }
  0x87   :  { %v2615_v45 = vpop.permute.xlu1 %63 }
  0x88   :  { %v128_v47 = vmul.f32 %v2570_v20, %v2615_v45  ;;  %246 = vmatpush.msra.mxu1 %v180_v46  ;;  %v2620_v48 = vpop.permute.xlu0 %58 }
  0x89   :  { %v127_v53 = vmul.f32 %v2570_v20, %v2620_v48  ;;  %v2670_v21 = vpop.permute.xlu2 %82 }
  0x8a   :  { %v136_v51 = vadd.f32 %v128_v47, %v2583_v26  ;;  %2219 = vmatpush.xpose.msk.msra.mxu0 %vm182_vm1, %v180_v46  ;;  %247 = vmatpush.msra.mxu1 %v179_v49  ;;  %v141_v28 = vmul.f32 %v2577_v23, %v2670_v21 }
  0x8b   :  { %v135_v57 = vadd.f32 %v127_v53, %v2583_v26 }
  0x8c   :  { %v2631_v54 = vadd.f32 %v145_v50, %v136_v51 }
  0x8d   :  { %373 = vxpose.xlu2.b32.end [8/8] (short) (narrow) %v121_v52, 8 }
  0x8e   :  { %2220 = vmatpush.xpose.msk.msra.mxu0 %vm182_vm1, %v179_v49  ;;  %v169_v55 = vmax.f32 %v2631_v54, 0.0  ;;  %vm161_vm10 = vcmp.gt.f32.partialorder %v2631_v54, 0.0 }
  0x90   :  { %v2638_v58 = vpop.permute.xlu1 %94  ;;  %v178_v59 = vsel %vm173_vm2, %v169_v55, 1.0 }
  0x91   :  { %v144_v60 = vmul.f32 %v2577_v23, %v2638_v58  ;;  %248 = vmatpush.msra.mxu1 %v178_v59 }
  0x92   :  { %2221 = vmatpush.xpose.msk.msra.mxu0 %vm182_vm1, %v178_v59  ;;  %v2646_v62 = vpop.permute.xlu0 %86 }
  0x93   :  { %v2648_v63 = vadd.f32 %v144_v60, %v135_v57  ;;  %v142_v3 = vmul.f32 %v2577_v23, %v2646_v62 }
  0x95   :  { %v168_v5 = vmax.f32 %v2648_v63, 0.0  ;;  %v2663_v10 = vadd.f32 %v142_v3, %v133_v2  ;;  %vm160_vm11 = vcmp.gt.f32.partialorder %v2648_v63, 0.0 }
  0x97   :  { %v177_v6 = vsel %vm173_vm2, %v168_v5, 1.0  ;;  %v166_v14 = vmax.f32 %v2663_v10, 0.0  ;;  %vm158_vm13 = vcmp.gt.f32.partialorder %v2663_v10, 0.0 }
  0x98   :  { %2222 = vmatpush.xpose.msk.msra.mxu0 %vm182_vm1, %v177_v6  ;;  %249 = vmatpush.msra.mxu1 %v177_v6  ;;  %v2658_v7 = vpop.permute.xlu1 %90 }
  0x99   :  { %v143_v9 = vmul.f32 %v2577_v23, %v2658_v7  ;;  %v175_v24 = vsel %vm173_vm2, %v166_v14, 1.0 }
  0x9b   :  { %v2665_v11 = vadd.f32 %v143_v9, %v134_v8 }
  0x9d   :  { %v167_v12 = vmax.f32 %v2665_v11, 0.0  ;;  %vm159_vm12 = vcmp.gt.f32.partialorder %v2665_v11, 0.0 }
  0x9f   :  { %v176_v16 = vsel %vm173_vm2, %v167_v12, 1.0 }
  0xa0   :  { %2223 = vmatpush.xpose.msk.msra.mxu0 %vm182_vm1, %v176_v16  ;;  %250 = vmatpush.msra.mxu1 %v176_v16 }
  0xa1   :  { %v2673_v22 = vpop.permute.xlu1 %43 }
  0xa2   :  { %v124_v27 = vmul.f32 %v2570_v20, %v2673_v22  ;;  %251 = vmatpush.msra.mxu1 %v175_v24 }
  0xa4   :  { %v132_v29 = vadd.f32 %v124_v27, %v2583_v26  ;;  %2224 = vmatpush.xpose.msk.msra.mxu0 %vm182_vm1, %v175_v24 }
  0xa6   :  { %v2682_v30 = vadd.f32 %v141_v28, %v132_v29 }
  0xa8   :  { %v165_v33 = vmax.f32 %v2682_v30, 0.0  ;;  %vm157_vm14 = vcmp.gt.f32.partialorder %v2682_v30, 0.0 }
  0xaa   :  { %v174_v34 = vsel %vm173_vm2, %v165_v33, 1.0 }
  0xab   :  { %2225 = vmatpush.xpose.msk.msra.mxu0 %vm182_vm1, %v174_v34  ;;  %252 = vmatpush.msra.mxu1 %v174_v34 }
  0xae   :  { %2226 = vmatmul.msk.f32.vlgmr.msra.gmra.mxu0 %vm182_vm1, %v2690_v35 }
  0xee   :  { %v2725_v60 = vpop.trf.xlu2 }
  0xf6   :  { %1211 = vperm.xlu2 %2443, %v2320_v39  }
  0xfe   :  { %2446 = vset.pattern.permute.xlu2 %v3490_v0 }
 0x12b   :  { %v227_v41 = vpop.f32.mrf.mxu0 }
 0x12c   :  { %231 = vst.msk [vmem:[%s3487_s6] sm:$0x7] %vm230_vm3, %v227_v41  ;;  %v232_v43 = vsub.f32 %v227_v41, %v2701_v40 }
 0x12e   :  { %257 = vxpose.xlu1.b32.start.end [1/1] (short) (narrow) %v232_v43, 64  ;;  %2227 = vmatmul.msk.f32.vlgmr.msra.gmra.mxu1 %vm233_vm4, %v232_v43 }
 0x150   :  { %v2727_v61 = vpop.permute.xlu2 %1211 }
 0x151   :  { %v1245_v3 = vmul.f32 %v2727_v61, %v2577_v23 }
 0x1ab   :  { %v254_v44 = vpop.f32.mrf.mxu1 }
 0x1ac   :  { %v423_v46 = vmul.f32 5.2083335e-05, %v254_v44 }
 0x1ae   :  { %v2712_v47 = vsub.f32 %v2690_v35, %v423_v46 }
 0x1b0   :  { %2257 = vmatpush.msk.msrb.mxu0 %vm314_vm5, %v2712_v47 }
 0x1c0   :  { %1179 = vperm.xlu1 %2442, %v2320_v39  }
 0x1c8   :  { %2445 = vset.pattern.permute.xlu1 %v3492_v4 }
 0x1d2   :  { %v273_v49 = vpop.trf.xlu1 }
 0x1d3   :  { %2229 = vmatmul.msk.f32.vlgmr.msra.gmra.mxu2 %vm289_vm6, %v273_v49 }
 0x1da   :  { %v274_v50 = vpop.trf.xlu1 }
 0x1db   :  { %2230 = vmatmul.msk.f32.gmra.mxu2 %vm289_vm6, %v274_v50 }
 0x1e2   :  { %v275_v51 = vpop.trf.xlu1 }
 0x1e3   :  { %2231 = vmatmul.msk.f32.gmra.mxu2 %vm289_vm6, %v275_v51 }
 0x1ea   :  { %v276_v52 = vpop.trf.xlu1 }
 0x1eb   :  { %2232 = vmatmul.msk.f32.gmra.mxu2 %vm289_vm6, %v276_v52 }
 0x1f2   :  { %v277_v53 = vpop.trf.xlu1 }
 0x1f3   :  { %2233 = vmatmul.msk.f32.gmra.mxu2 %vm289_vm6, %v277_v53 }
 0x1fa   :  { %v278_v55 = vpop.trf.xlu1 }
 0x1fb   :  { %2234 = vmatmul.msk.f32.gmra.mxu2 %vm289_vm6, %v278_v55 }
 0x202   :  { %v279_v57 = vpop.trf.xlu1 }
 0x203   :  { %2235 = vmatmul.msk.f32.gmra.mxu2 %vm289_vm6, %v279_v57 }
 0x20a   :  { %v280_v59 = vpop.trf.xlu1 }
 0x20b   :  { %2236 = vmatmul.msk.f32.gmra.mxu2 %vm289_vm6, %v280_v59 }
 0x232   :  { %v2729_v1 = vpop.permute.xlu1 %1179 }
 0x233   :  { %v1229_v2 = vmul.f32 %v2729_v1, %v2570_v20 }
 0x235   :  { %v1237_v5 = vadd.f32 %v1229_v2, %v2583_v26 }
 0x237   :  { %v2736_v6 = vadd.f32 %v1245_v3, %v1237_v5 }
 0x239   :  { %v1269_v8 = vmax.f32 %v2736_v6, 0.0 }
 0x23b   :  { %v2740_v9 = vsel %vm173_vm2, %v1269_v8, 1.0 }
 0x23c   :  { %2330 = vmatpush.xpose.msk.msra.mxu0 %vm182_vm1, %v2740_v9 }
 0x256   :  { %v334_v12 = vpop.f32.mrf.mxu2 }
 0x25e   :  { %v337_v14 = vpop.f32.mrf.mxu2 }
 0x266   :  { %v340_v16 = vpop.f32.mrf.mxu2 }
 0x26e   :  { %v343_v24 = vpop.f32.mrf.mxu2 }
 0x276   :  { %v346_v27 = vpop.f32.mrf.mxu2 }
 0x27e   :  { %v349_v28 = vpop.f32.mrf.mxu2 }
 0x286   :  { %v352_v29 = vpop.f32.mrf.mxu2 }
 0x28e   :  { %v355_v33 = vpop.f32.mrf.mxu2 }
 0x28f   :  { %2237 = vmatpush.msk.msra.mxu3 %vm164_vm7, %v355_v33 }
 0x291   :  { %2238 = vmatpush.msk.msra.mxu3 %vm163_vm8, %v352_v29 }
 0x293   :  { %2239 = vmatpush.msk.msra.mxu3 %vm162_vm9, %v349_v28 }
 0x295   :  { %2240 = vmatpush.msk.msra.mxu3 %vm161_vm10, %v346_v27 }
 0x297   :  { %2241 = vmatpush.msk.msra.mxu3 %vm160_vm11, %v343_v24 }
 0x299   :  { %2242 = vmatpush.msk.msra.mxu3 %vm159_vm12, %v340_v16 }
 0x29b   :  { %2243 = vmatpush.msk.msra.mxu3 %vm158_vm13, %v337_v14 }
 0x29d   :  { %2244 = vmatpush.msk.msra.mxu3 %vm157_vm14, %v334_v12 }
 0x29e   :  { %2245 = vmatmul.msk.f32.vlgmr.msra.gmra.mxu3 %vm233_vm4, %v2725_v60 }
 0x321   :  { %v418_v36 = vpop.f32.mrf.mxu3 }
 0x322   :  { %v421_v37 = vmul.f32 5.2083335e-05, %v418_v36 }
 0x324   :  { %v2755_v38 = vsub.f32 %v2563_v17, %v421_v37 }
 0x326   :  { %v426_v54 = vperm.slane %v2755_v38, 0  ;;  %v443_v63 = vperm.slane %v2755_v38, 1  ;;  %v425_v11 = vperm.slane %v2755_v38, 2 }
 0x328   :  { %v434_v10 = vmul.f32 %v426_v54, %v2567_v19  ;;  %v433_v34 = vmul.f32 %v426_v54, %v2565_v18  ;;  %v451_v30 = vmul.f32 %v443_v63, %v2591_v31  ;;  %v450_v39 = vmul.f32 %v443_v63, %v2593_v32 }
 0x329   :  { %v432_v41 = vmul.f32 %v426_v54, %v2554_v13  ;;  %v431_v43 = vmul.f32 %v426_v54, %v2615_v45  ;;  %v449_v46 = vmul.f32 %v443_v63, %v2557_v15  ;;  %v430_v49 = vmul.f32 %v426_v54, %v2620_v48 }
 0x32a   :  { %v442_v17 = vadd.f32 %v434_v10, %v425_v11  ;;  %v441_v44 = vadd.f32 %v433_v34, %v425_v11  ;;  %v448_v52 = vmul.f32 %v443_v63, %v2580_v25  ;;  %v429_v53 = vmul.f32 %v426_v54, %v2610_v42 }
 0x32b   :  { %v440_v50 = vadd.f32 %v432_v41, %v425_v11  ;;  %v439_v51 = vadd.f32 %v431_v43, %v425_v11  ;;  %v438_v59 = vadd.f32 %v430_v49, %v425_v11  ;;  %v428_v2 = vmul.f32 %v426_v54, %v2635_v56 }
 0x32c   :  { %v2770_v55 = vadd.f32 %v451_v30, %v442_v17  ;;  %v2772_v57 = vadd.f32 %v450_v39, %v441_v44  ;;  %v447_v5 = vmul.f32 %v443_v63, %v2638_v58  ;;  %v437_v16 = vadd.f32 %v429_v53, %v425_v11 }
 0x32d   :  { %v2775_v3 = vadd.f32 %v449_v46, %v440_v50  ;;  %v2780_v14 = vadd.f32 %v448_v52, %v439_v51  ;;  %v446_v24 = vmul.f32 %v443_v63, %v2658_v7  ;;  %v427_v27 = vmul.f32 %v426_v54, %v2673_v22 }
 0x32e   :  { %v475_v8 = vmax.f32 %v2770_v55, 0.0  ;;  %v474_v12 = vmax.f32 %v2772_v57, 0.0  ;;  %v2786_v33 = vadd.f32 %v447_v5, %v438_v59  ;;  %v436_v36 = vadd.f32 %v428_v2, %v425_v11 }
 0x32f   :  { %v473_v29 = vmax.f32 %v2775_v3, 0.0  ;;  %v445_v37 = vmul.f32 %v443_v63, %v2646_v62  ;;  %v472_v34 = vmax.f32 %v2780_v14, 0.0  ;;  %v2792_v30 = vadd.f32 %v446_v24, %v437_v16 }
 0x330   :  { %v483_v28 = vsel %vm173_vm2, %v475_v8, 1.0  ;;  %v482_v10 = vsel %vm173_vm2, %v474_v12, 1.0  ;;  %v435_v39 = vadd.f32 %v427_v27, %v425_v11  ;;  %v471_v41 = vmax.f32 %v2786_v33, 0.0 }
 0x331   :  { %2246 = vmatpush.xpose.msk.msrb.mxu1 %vm182_vm1, %v483_v28  ;;  %545 = vmatpush.msrb.mxu3 %v483_v28  ;;  %v481_v54 = vsel %vm173_vm2, %v473_v29, 1.0  ;;  %v2796_v43 = vadd.f32 %v445_v37, %v436_v36  ;;  %v444_v17 = vmul.f32 %v443_v63, %v2670_v21  ;;  %v480_v44 = vsel %vm173_vm2, %v472_v34, 1.0 }
 0x332   :  { %v470_v46 = vmax.f32 %v2792_v30, 0.0  ;;  %v479_v11 = vsel %vm173_vm2, %v471_v41, 1.0  ;;  %vm467_vm15 = vcmp.gt.f32.partialorder %v2770_v55, 0.0  ;;  %vm466_vm7 = vcmp.gt.f32.partialorder %v2772_v57, 0.0 }
 0x333   :  { %546 = vmatpush.msrb.mxu3 %v482_v10  ;;  %v2802_v49 = vadd.f32 %v444_v17, %v435_v39  ;;  %v469_v50 = vmax.f32 %v2796_v43, 0.0  ;;  %vm465_vm8 = vcmp.gt.f32.partialorder %v2775_v3, 0.0  ;;  %vm464_vm9 = vcmp.gt.f32.partialorder %v2780_v14, 0.0 }
 0x334   :  { %v478_v51 = vsel %vm173_vm2, %v470_v46, 1.0  ;;  %vm463_vm10 = vcmp.gt.f32.partialorder %v2786_v33, 0.0  ;;  %vm462_vm11 = vcmp.gt.f32.partialorder %v2792_v30, 0.0  ;;  %vm461_vm12 = vcmp.gt.f32.partialorder %v2796_v43, 0.0 }
 0x335   :  { %2247 = vmatpush.xpose.msk.msrb.mxu1 %vm182_vm1, %v482_v10  ;;  %547 = vmatpush.msrb.mxu3 %v481_v54  ;;  %v468_v63 = vmax.f32 %v2802_v49, 0.0  ;;  %v477_v52 = vsel %vm173_vm2, %v469_v50, 1.0  ;;  %vm460_vm13 = vcmp.gt.f32.partialorder %v2802_v49, 0.0 }
 0x337   :  { %548 = vmatpush.msrb.mxu3 %v480_v44  ;;  %v476_v53 = vsel %vm173_vm2, %v468_v63, 1.0 }
 0x339   :  { %2248 = vmatpush.xpose.msk.msrb.mxu1 %vm182_vm1, %v481_v54  ;;  %549 = vmatpush.msrb.mxu3 %v479_v11 }
 0x33b   :  { %550 = vmatpush.msrb.mxu3 %v478_v51 }
 0x33d   :  { %2249 = vmatpush.xpose.msk.msrb.mxu1 %vm182_vm1, %v480_v44  ;;  %551 = vmatpush.msrb.mxu3 %v477_v52 }
 0x33f   :  { %552 = vmatpush.msrb.mxu3 %v476_v53 }
 0x341   :  { %2250 = vmatpush.xpose.msk.msrb.mxu1 %vm182_vm1, %v479_v11 }
 0x345   :  { %2251 = vmatpush.xpose.msk.msrb.mxu1 %vm182_vm1, %v478_v51 }
 0x349   :  { %2252 = vmatpush.xpose.msk.msrb.mxu1 %vm182_vm1, %v477_v52 }
 0x34d   :  { %2253 = vmatpush.xpose.msk.msrb.mxu1 %vm182_vm1, %v476_v53 }
 0x350   :  { %2254 = vmatmul.msk.f32.vlgmr.msrb.gmra.mxu1 %vm182_vm1, %v2712_v47 }
 0x351   :  { %2427 = vmatpush.msk.msra.mxu1 %vm314_vm5, %v2712_v47 }
 0x3cd   :  { %v528_v59 = vpop.f32.mrf.mxu1 }
 0x3ce   :  { %2255 = vst.msk [vmem:[%s3487_s6 + $0x4] sm:$0x7] %vm230_vm3, %v528_v59  ;;  %v533_v2 = vsub.f32 %v528_v59, %v2701_v40 }
 0x3d0   :  { %557 = vxpose.xlu0.b32.start.end [1/1] (short) (narrow) %v533_v2, 64  ;;  %2256 = vmatmul.msk.f32.vlgmr.msrb.gmra.mxu3 %vm233_vm4, %v533_v2 }
 0x453   :  { %v554_v17 = vpop.f32.mrf.mxu3 }
 0x454   :  { %v686_v46 = vmul.f32 5.2083335e-05, %v554_v17 }
 0x456   :  { %v2843_v55 = vsub.f32 %v2712_v47, %v686_v46 }
 0x474   :  { %v573_v5 = vpop.trf.xlu0 }
 0x475   :  { %2258 = vmatmul.msk.f32.vlgmr.msrb.gmra.mxu0 %vm289_vm6, %v573_v5 }
 0x47c   :  { %v574_v8 = vpop.trf.xlu0 }
 0x47d   :  { %2259 = vmatmul.msk.f32.gmra.mxu0 %vm289_vm6, %v574_v8 }
 0x484   :  { %v575_v12 = vpop.trf.xlu0 }
 0x485   :  { %2260 = vmatmul.msk.f32.gmra.mxu0 %vm289_vm6, %v575_v12 }
 0x48c   :  { %v576_v16 = vpop.trf.xlu0 }
 0x48d   :  { %2261 = vmatmul.msk.f32.gmra.mxu0 %vm289_vm6, %v576_v16 }
 0x494   :  { %v577_v24 = vpop.trf.xlu0 }
 0x495   :  { %2262 = vmatmul.msk.f32.vlgmr.msra.gmra.mxu1 %vm289_vm6, %v577_v24 }
 0x49c   :  { %v578_v27 = vpop.trf.xlu0 }
 0x49d   :  { %2263 = vmatmul.msk.f32.gmra.mxu1 %vm289_vm6, %v578_v27 }
 0x4a4   :  { %v579_v28 = vpop.trf.xlu0 }
 0x4a5   :  { %2264 = vmatmul.msk.f32.gmra.mxu1 %vm289_vm6, %v579_v28 }
 0x4ac   :  { %v580_v29 = vpop.trf.xlu0 }
 0x4ad   :  { %2265 = vmatmul.msk.f32.gmra.mxu1 %vm289_vm6, %v580_v29 }
 0x4f2   :  { %v632_v37 = vpop.f32.mrf.mxu0 }
 0x4fa   :  { %v635_v34 = vpop.f32.mrf.mxu0 }
 0x502   :  { %v638_v54 = vpop.f32.mrf.mxu0 }
 0x50a   :  { %v641_v44 = vpop.f32.mrf.mxu0 }
 0x512   :  { %v644_v36 = vpop.f32.mrf.mxu1 }
 0x51a   :  { %v647_v10 = vpop.f32.mrf.mxu1 }
 0x522   :  { %v650_v39 = vpop.f32.mrf.mxu1 }
 0x52a   :  { %v653_v41 = vpop.f32.mrf.mxu1 }
 0x52b   :  { %2266 = vmatpush.msk.msra.mxu3 %vm467_vm15, %v653_v41 }
 0x52d   :  { %2267 = vmatpush.msk.msra.mxu3 %vm466_vm7, %v650_v39 }
 0x52f   :  { %2268 = vmatpush.msk.msra.mxu3 %vm465_vm8, %v647_v10 }
 0x531   :  { %2269 = vmatpush.msk.msra.mxu3 %vm464_vm9, %v644_v36 }
 0x533   :  { %2270 = vmatpush.msk.msra.mxu3 %vm463_vm10, %v641_v44 }
 0x535   :  { %2271 = vmatpush.msk.msra.mxu3 %vm462_vm11, %v638_v54 }
 0x537   :  { %2272 = vmatpush.msk.msra.mxu3 %vm461_vm12, %v635_v34 }
 0x539   :  { %2273 = vmatpush.msk.msra.mxu3 %vm460_vm13, %v632_v37 }
 0x53a   :  { %2274 = vmatmul.msk.f32.vlgmr.msra.gmra.mxu3 %vm233_vm4, %v2725_v60 }
 0x53b   :  { %2286 = vmatpush.msk.msrb.mxu3 %vm314_vm5, %v2843_v55 }
 0x5bd   :  { %v681_v57 = vpop.f32.mrf.mxu3 }
 0x5be   :  { %v684_v3 = vmul.f32 5.2083335e-05, %v681_v57 }
 0x5c0   :  { %v2850_v14 = vsub.f32 %v2755_v38, %v684_v3 }
 0x5c2   :  { %v689_v33 = vperm.slane %v2850_v14, 0  ;;  %v706_v30 = vperm.slane %v2850_v14, 1  ;;  %v688_v43 = vperm.slane %v2850_v14, 2 }
 0x5c4   :  { %v697_v47 = vmul.f32 %v689_v33, %v2567_v19  ;;  %v696_v49 = vmul.f32 %v689_v33, %v2565_v18  ;;  %v714_v11 = vmul.f32 %v706_v30, %v2591_v31  ;;  %v713_v50 = vmul.f32 %v706_v30, %v2593_v32 }
 0x5c5   :  { %v695_v51 = vmul.f32 %v689_v33, %v2554_v13  ;;  %v694_v63 = vmul.f32 %v689_v33, %v2615_v45  ;;  %v712_v53 = vmul.f32 %v706_v30, %v2557_v15  ;;  %v693_v59 = vmul.f32 %v689_v33, %v2620_v48 }
 0x5c6   :  { %v705_v38 = vadd.f32 %v697_v47, %v688_v43  ;;  %v704_v52 = vadd.f32 %v696_v49, %v688_v43  ;;  %v711_v19 = vmul.f32 %v706_v30, %v2580_v25  ;;  %v692_v18 = vmul.f32 %v689_v33, %v2610_v42  ;;  %v2928_v47 = vld [vmem:[%s3483_s0 + $0x60] sm:$0xff]  ;;  %v2935_v49 = vld [vmem:[%s3483_s0 + $0x58] sm:$0xff] }
 0x5c7   :  { %v703_v2 = vadd.f32 %v695_v51, %v688_v43  ;;  %v702_v5 = vadd.f32 %v694_v63, %v688_v43  ;;  %v701_v32 = vadd.f32 %v693_v59, %v688_v43  ;;  %v691_v13 = vmul.f32 %v689_v33, %v2635_v56  ;;  %v2949_v51 = vld [vmem:[%s3483_s0 + $0x50] sm:$0xff]  ;;  %v2956_v63 = vld [vmem:[%s3483_s0 + $0x48] sm:$0xff] }
 0x5c8   :  { %v2865_v8 = vadd.f32 %v714_v11, %v705_v38  ;;  %v2867_v31 = vadd.f32 %v713_v50, %v704_v52  ;;  %v710_v12 = vmul.f32 %v706_v30, %v2638_v58  ;;  %v700_v25 = vadd.f32 %v692_v18, %v688_v43 }
 0x5c9   :  { %v2870_v45 = vadd.f32 %v712_v53, %v703_v2  ;;  %v2875_v16 = vadd.f32 %v711_v19, %v702_v5  ;;  %v709_v42 = vmul.f32 %v706_v30, %v2658_v7  ;;  %v690_v24 = vmul.f32 %v689_v33, %v2673_v22 }
 0x5ca   :  { %v738_v15 = vmax.f32 %v2865_v8, 0.0  ;;  %v737_v48 = vmax.f32 %v2867_v31, 0.0  ;;  %v2881_v56 = vadd.f32 %v710_v12, %v701_v32  ;;  %v699_v29 = vadd.f32 %v691_v13, %v688_v43 }
 0x5cb   :  { %v736_v28 = vmax.f32 %v2870_v45, 0.0  ;;  %v708_v58 = vmul.f32 %v706_v30, %v2646_v62  ;;  %v735_v37 = vmax.f32 %v2875_v16, 0.0  ;;  %v2887_v10 = vadd.f32 %v709_v42, %v700_v25 }
 0x5cc   :  { %v746_v27 = vsel %vm173_vm2, %v738_v15, 1.0  ;;  %v745_v36 = vsel %vm173_vm2, %v737_v48, 1.0  ;;  %v698_v7 = vadd.f32 %v690_v24, %v688_v43  ;;  %v734_v34 = vmax.f32 %v2881_v56, 0.0  ;;  %v2921_v43 = vld [vmem:[%s3483_s0 + $0x68] sm:$0xff] }
 0x5cd   :  { %2275 = vmatpush.xpose.msk.msrb.mxu2 %vm182_vm1, %v746_v27  ;;  %808 = vmatpush.msrb.mxu1 %v746_v27  ;;  %v744_v22 = vsel %vm173_vm2, %v736_v28, 1.0  ;;  %v2891_v39 = vadd.f32 %v708_v58, %v699_v29  ;;  %v707_v54 = vmul.f32 %v706_v30, %v2670_v21  ;;  %v743_v62 = vsel %vm173_vm2, %v735_v37, 1.0  ;;  %v2916_v30 = vld [vmem:[%s3483_s0 + $0x70] sm:$0xff] }
 0x5ce   :  { %v733_v41 = vmax.f32 %v2887_v10, 0.0  ;;  %v742_v44 = vsel %vm173_vm2, %v734_v34, 1.0  ;;  %1207 = vperm.xlu1 %2445, %v2916_v30   ;;  %1169 = vperm.xlu2 %2446, %v2921_v43   ;;  %vm730_vm14 = vcmp.gt.f32.partialorder %v2865_v8, 0.0  ;;  %vm729_vm15 = vcmp.gt.f32.partialorder %v2867_v31, 0.0 }
 0x5cf   :  { %809 = vmatpush.msrb.mxu1 %v745_v36  ;;  %v2897_v17 = vadd.f32 %v707_v54, %v698_v7  ;;  %v732_v46 = vmax.f32 %v2891_v39, 0.0  ;;  %vm728_vm7 = vcmp.gt.f32.partialorder %v2870_v45, 0.0  ;;  %vm727_vm8 = vcmp.gt.f32.partialorder %v2875_v16, 0.0 }
 0x5d0   :  { %v741_v57 = vsel %vm173_vm2, %v733_v41, 1.0  ;;  %vm726_vm9 = vcmp.gt.f32.partialorder %v2881_v56, 0.0  ;;  %vm725_vm10 = vcmp.gt.f32.partialorder %v2887_v10, 0.0  ;;  %vm724_vm11 = vcmp.gt.f32.partialorder %v2891_v39, 0.0 }
 0x5d1   :  { %2276 = vmatpush.xpose.msk.msrb.mxu2 %vm182_vm1, %v745_v36  ;;  %810 = vmatpush.msrb.mxu1 %v744_v22  ;;  %v731_v21 = vmax.f32 %v2897_v17, 0.0  ;;  %v740_v3 = vsel %vm173_vm2, %v732_v46, 1.0  ;;  %vm723_vm12 = vcmp.gt.f32.partialorder %v2897_v17, 0.0 }
 0x5d3   :  { %811 = vmatpush.msrb.mxu1 %v743_v62  ;;  %v739_v33 = vsel %vm173_vm2, %v731_v21, 1.0  ;;  %v40_v21 = vld [vmem:[%s3488_s2 + $0x38] sm:$0xff] }
 0x5d5   :  { %2277 = vmatpush.xpose.msk.msrb.mxu2 %vm182_vm1, %v744_v22  ;;  %812 = vmatpush.msrb.mxu1 %v742_v44 }
 0x5d6   :  { %1203 = vperm.xlu1 %2445, %v2921_v43   ;;  %1164 = vperm.xlu2 %2446, %v2928_v47  }
 0x5d7   :  { %813 = vmatpush.msrb.mxu1 %v741_v57 }
 0x5d9   :  { %2278 = vmatpush.xpose.msk.msrb.mxu2 %vm182_vm1, %v743_v62  ;;  %814 = vmatpush.msrb.mxu1 %v740_v3 }
 0x5db   :  { %815 = vmatpush.msrb.mxu1 %v739_v33 }
 0x5dd   :  { %2279 = vmatpush.xpose.msk.msrb.mxu2 %vm182_vm1, %v742_v44 }
 0x5de   :  { %1199 = vperm.xlu1 %2445, %v2928_v47   ;;  %1159 = vperm.xlu2 %2446, %v2935_v49  }
 0x5e1   :  { %2280 = vmatpush.xpose.msk.msrb.mxu2 %vm182_vm1, %v741_v57 }
 0x5e5   :  { %2281 = vmatpush.xpose.msk.msrb.mxu2 %vm182_vm1, %v740_v3 }
 0x5e6   :  { %1195 = vperm.xlu1 %2445, %v2935_v49   ;;  %1154 = vperm.xlu2 %2446, %v2949_v51  }
 0x5e9   :  { %2282 = vmatpush.xpose.msk.msrb.mxu2 %vm182_vm1, %v739_v33 }
 0x5ec   :  { %2283 = vmatmul.msk.f32.vlgmr.msrb.gmra.mxu2 %vm182_vm1, %v2843_v55 }
 0x5ee   :  { %1191 = vperm.xlu1 %2445, %v2949_v51   ;;  %1149 = vperm.xlu2 %2446, %v2956_v63  }
 0x5f6   :  { %1187 = vperm.xlu1 %2445, %v2956_v63  }
 0x628   :  { %v2981_v13 = vpop.permute.xlu2 %1169 }
 0x629   :  { %v1227_v27 = vmul.f32 %v2981_v13, %v2570_v20 }
 0x62b   :  { %v1235_v58 = vadd.f32 %v1227_v27, %v2583_v26 }
 0x630   :  { %v2985_v15 = vpop.permute.xlu2 %1164 }
 0x631   :  { %v1226_v37 = vmul.f32 %v2985_v15, %v2570_v20 }
 0x633   :  { %v1234_v44 = vadd.f32 %v1226_v37, %v2583_v26 }
 0x638   :  { %v2989_v25 = vpop.permute.xlu2 %1159 }
 0x639   :  { %v1225_v54 = vmul.f32 %v2989_v25, %v2570_v20 }
 0x63b   :  { %v1233_v33 = vadd.f32 %v1225_v54, %v2583_v26 }
 0x640   :  { %v2979_v32 = vpop.permute.xlu1 %1207  ;;  %v2993_v24 = vpop.permute.xlu2 %1154 }
 0x641   :  { %v1244_v22 = vmul.f32 %v2979_v32, %v2577_v23 }
 0x648   :  { %v2983_v12 = vpop.permute.xlu1 %1203  ;;  %v3013_v62 = vpop.permute.xlu2 %1149 }
 0x649   :  { %v1243_v36 = vmul.f32 %v2983_v12, %v2577_v23 }
 0x64b   :  { %v3015_v41 = vadd.f32 %v1243_v36, %v1235_v58 }
 0x650   :  { %v2987_v48 = vpop.permute.xlu1 %1199 }
 0x651   :  { %v1242_v46 = vmul.f32 %v2987_v48, %v2577_v23 }
 0x658   :  { %v2991_v42 = vpop.permute.xlu1 %1195 }
 0x660   :  { %v2997_v28 = vpop.permute.xlu1 %1191 }
 0x66f   :  { %v791_v11 = vpop.f32.mrf.mxu2 }
 0x670   :  { %2284 = vst.msk [vmem:[%s3487_s6 + $0x8] sm:$0x7] %vm230_vm3, %v791_v11  ;;  %v796_v50 = vsub.f32 %v791_v11, %v2701_v40  ;;  %v2964_v40 = vld [vmem:[%s3483_s0 + $0x40] sm:$0xff]  ;;  %v1241_v11 = vmul.f32 %v2991_v42, %v2577_v23 }
 0x671   :  { %1183 = vperm.xlu1 %2445, %v2964_v40   ;;  %1144 = vperm.xlu2 %2446, %v2964_v40  }
 0x672   :  { %820 = vxpose.xlu0.b32.start.end [1/1] (short) (narrow) %v796_v50, 64  ;;  %2285 = vmatmul.msk.f32.vlgmr.msrb.gmra.mxu1 %vm233_vm4, %v796_v50  ;;  %v3029_v50 = vpop.permute.xlu1 %1187 }
 0x679   :  { %2447 = vset.pattern.permute.xlu1 %v3490_v0 }
 0x67a   :  { %989 = vperm.xlu1 %2447, %v40_v21  }
 0x682   :  { %2448 = vset.pattern.permute.xlu1 %v3492_v4 }
 0x683   :  { %1038 = vperm.xlu1 %2448, %v40_v21  }
 0x68b   :  { %2449 = vset.pattern.permute.xlu1 %v3490_v0 }
 0x6cb   :  { %v3052_v36 = vpop.permute.xlu2 %1144 }
 0x6cc   :  { %v1222_v54 = vmul.f32 %v3052_v36, %v2570_v20 }
 0x6d9   :  { %2444 = vset.pattern.permute.xlu0 %v3490_v0  ;;  %v34_v0 = vld [vmem:[%s3488_s2 + $0x8] sm:$0xff] }
 0x6ef   :  { %v3147_v10 = vpop.f32.mrf.mxu1 }
 0x716   :  { %v836_v38 = vpop.trf.xlu0 }
 0x717   :  { %2287 = vmatmul.msk.f32.vlgmr.msrb.gmra.mxu3 %vm289_vm6, %v836_v38  ;;  %v3031_v38 = vadd.f32 %v1242_v46, %v1234_v44 }
 0x718   :  { %1174 = vperm.xlu0 %2444, %v2916_v30  }
 0x719   :  { %v1266_v58 = vmax.f32 %v3031_v38, 0.0 }
 0x71b   :  { %v3067_v44 = vsel %vm173_vm2, %v1266_v58, 1.0 }
 0x71e   :  { %v837_v52 = vpop.trf.xlu0 }
 0x71f   :  { %2288 = vmatmul.msk.f32.gmra.mxu3 %vm289_vm6, %v837_v52  ;;  %v1224_v52 = vmul.f32 %v2993_v24, %v2570_v20 }
 0x720   :  { %2450 = vset.pattern.permute.xlu0 %v3492_v4 }
 0x726   :  { %v838_v53 = vpop.trf.xlu0 }
 0x727   :  { %2289 = vmatmul.msk.f32.gmra.mxu3 %vm289_vm6, %v838_v53 }
 0x72e   :  { %v839_v59 = vpop.trf.xlu0 }
 0x72f   :  { %2290 = vmatmul.msk.f32.gmra.mxu3 %vm289_vm6, %v839_v59  ;;  %v1267_v59 = vmax.f32 %v3015_v41, 0.0 }
 0x731   :  { %v3049_v27 = vsel %vm173_vm2, %v1267_v59, 1.0 }
 0x736   :  { %v840_v2 = vpop.trf.xlu0 }
 0x737   :  { %2291 = vmatmul.msk.f32.gmra.mxu3 %vm289_vm6, %v840_v2  ;;  %v3041_v2 = vadd.f32 %v1241_v11, %v1233_v33  ;;  %v1230_v33 = vadd.f32 %v1222_v54, %v2583_v26 }
 0x739   :  { %v1265_v46 = vmax.f32 %v3041_v2, 0.0 }
 0x73e   :  { %v841_v5 = vpop.trf.xlu0 }
 0x73f   :  { %2292 = vmatmul.msk.f32.gmra.mxu3 %vm289_vm6, %v841_v5  ;;  %v1223_v5 = vmul.f32 %v3013_v62, %v2570_v20 }
 0x741   :  { %v1231_v37 = vadd.f32 %v1223_v5, %v2583_v26  ;;  %v39_v5 = vld [vmem:[%s3488_s2 + $0x30] sm:$0xff] }
 0x742   :  { %984 = vperm.xlu1 %2449, %v39_v5   ;;  %1034 = vperm.xlu0 %2450, %v39_v5  }
 0x746   :  { %v842_v19 = vpop.trf.xlu0 }
 0x747   :  { %2293 = vmatmul.msk.f32.gmra.mxu3 %vm289_vm6, %v842_v19  ;;  %v1232_v19 = vadd.f32 %v1224_v52, %v2583_v26  ;;  %v1273_v52 = vsel %vm173_vm2, %v1265_v46, 1.0 }
 0x74e   :  { %v843_v18 = vpop.trf.xlu0 }
 0x74f   :  { %2294 = vmatmul.msk.f32.gmra.mxu3 %vm289_vm6, %v843_v18  ;;  %v1240_v18 = vmul.f32 %v2997_v28, %v2577_v23 }
 0x78a   :  { %v2999_v29 = vpop.permute.xlu0 %1174 }
 0x78b   :  { %v1228_v7 = vmul.f32 %v2999_v29, %v2570_v20 }
 0x78d   :  { %v1236_v34 = vadd.f32 %v1228_v7, %v2583_v26  ;;  %v1239_v7 = vmul.f32 %v3029_v50, %v2577_v23 }
 0x78f   :  { %v3020_v57 = vadd.f32 %v1244_v22, %v1236_v34  ;;  %v3062_v34 = vadd.f32 %v1240_v18, %v1232_v19  ;;  %v3074_v21 = vadd.f32 %v1239_v7, %v1231_v37  ;;  %v3097_v7 = vld [vmem:[%s3488_s2 + $0x28] sm:$0xff] }
 0x790   :  { %979 = vperm.xlu1 %2449, %v3097_v7  }
 0x791   :  { %v1268_v3 = vmax.f32 %v3020_v57, 0.0  ;;  %v1264_v20 = vmax.f32 %v3062_v34, 0.0  ;;  %v1263_v18 = vmax.f32 %v3074_v21, 0.0  ;;  %vm1260_vm13 = vcmp.gt.f32.partialorder %v3020_v57, 0.0 }
 0x793   :  { %v3036_v53 = vsel %vm173_vm2, %v1268_v3, 1.0  ;;  %v3070_v3 = vpop.permute.xlu1 %1183  ;;  %v1272_v26 = vsel %vm173_vm2, %v1264_v20, 1.0 }
 0x794   :  { %2331 = vmatpush.xpose.msk.msra.mxu0 %vm182_vm1, %v3036_v53  ;;  %v1238_v11 = vmul.f32 %v3070_v3, %v2577_v23  ;;  %v1271_v23 = vsel %vm173_vm2, %v1263_v18, 1.0  ;;  %v35_v18 = vld [vmem:[%s3488_s2 + $0x10] sm:$0xff] }
 0x796   :  { %v3086_v19 = vadd.f32 %v1238_v11, %v1230_v33  ;;  %v37_v33 = vld [vmem:[%s3488_s2 + $0x20] sm:$0xff]  ;;  %v36_v11 = vld [vmem:[%s3488_s2 + $0x18] sm:$0xff] }
 0x797   :  { %1026 = vperm.xlu0 %2450, %v37_v33  }
 0x798   :  { %2332 = vmatpush.xpose.msk.msra.mxu0 %vm182_vm1, %v3049_v27  ;;  %v1262_v58 = vmax.f32 %v3086_v19, 0.0  ;;  %974 = vperm.xlu1 %2449, %v37_v33   ;;  %v33_v33 = vld [vmem:[%s3488_s2] sm:$0xff] }
 0x79a   :  { %v3060_v22 = vpop.f32.mrf.mxu3  ;;  %v1270_v54 = vsel %vm173_vm2, %v1262_v58, 1.0 }
 0x79c   :  { %2333 = vmatpush.xpose.msk.msra.mxu0 %vm182_vm1, %v3067_v44 }
 0x79f   :  { %1022 = vperm.xlu0 %2450, %v36_v11  }
 0x7a0   :  { %2334 = vmatpush.xpose.msk.msra.mxu0 %vm182_vm1, %v1273_v52  ;;  %969 = vperm.xlu1 %2449, %v36_v11  }
 0x7a2   :  { %v898_v59 = vpop.f32.mrf.mxu3 }
 0x7a4   :  { %2335 = vmatpush.xpose.msk.msra.mxu0 %vm182_vm1, %v1272_v26 }
 0x7a7   :  { %1018 = vperm.xlu0 %2450, %v35_v18  }
 0x7a8   :  { %2336 = vmatpush.xpose.msk.msra.mxu0 %vm182_vm1, %v1271_v23  ;;  %964 = vperm.xlu1 %2449, %v35_v18  }
 0x7aa   :  { %v901_v37 = vpop.f32.mrf.mxu3 }
 0x7ac   :  { %2337 = vmatpush.xpose.msk.msra.mxu0 %vm182_vm1, %v1270_v54 }
 0x7af   :  { %2338 = vmatmul.msk.f32.vlgmr.msra.gmra.mxu0 %vm182_vm1, %v2690_v35  ;;  %1014 = vperm.xlu0 %2450, %v34_v0  }
 0x7b0   :  { %959 = vperm.xlu1 %2449, %v34_v0   ;;  %v990_v0 = vpop.permute.xlu1 %989 }
 0x7b2   :  { %v904_v46 = vpop.f32.mrf.mxu3 }
 0x7b4   :  { %v1035_v11 = vpop.permute.xlu0 %1034 }
 0x7b7   :  { %1010 = vperm.xlu0 %2450, %v33_v33  }
 0x7b8   :  { %954 = vperm.xlu1 %2449, %v33_v33  }
 0x7ba   :  { %v907_v20 = vpop.f32.mrf.mxu3 }
 0x7c2   :  { %v910_v5 = vpop.f32.mrf.mxu3 }
 0x7ca   :  { %v913_v58 = vpop.f32.mrf.mxu3 }
 0x7d2   :  { %v916_v4 = vpop.f32.mrf.mxu3 }
 0x7d3   :  { %2295 = vmatpush.msk.msra.mxu1 %vm730_vm14, %v916_v4  ;;  %v1039_v4 = vpop.permute.xlu1 %1038  ;;  %vm1259_vm14 = vcmp.gt.f32.partialorder %v3015_v41, 0.0  ;;  %v2467_v41 = vld [vmem:[%s3485_s4] sm:$0x7] }
 0x7d5   :  { %2296 = vmatpush.msk.msra.mxu1 %vm729_vm15, %v913_v58  ;;  %vm1258_vm15 = vcmp.gt.f32.partialorder %v3031_v38, 0.0 }
 0x7d7   :  { %2297 = vmatpush.msk.msra.mxu1 %vm728_vm7, %v910_v5  ;;  %vm1257_vm7 = vcmp.gt.f32.partialorder %v3041_v2, 0.0 }
 0x7d9   :  { %2298 = vmatpush.msk.msra.mxu1 %vm727_vm8, %v907_v20  ;;  %vm1256_vm8 = vcmp.gt.f32.partialorder %v3062_v34, 0.0 }
 0x7db   :  { %2299 = vmatpush.msk.msra.mxu1 %vm726_vm9, %v904_v46  ;;  %v985_v8 = vpop.permute.xlu1 %984  ;;  %vm1255_vm9 = vcmp.gt.f32.partialorder %v3074_v21, 0.0  ;;  %v2468_v21 = vld [vmem:[%s3484_s3] sm:$0x7] }
 0x7dd   :  { %2300 = vmatpush.msk.msra.mxu1 %vm725_vm10, %v901_v37  ;;  %vm1254_vm10 = vcmp.gt.f32.partialorder %v3086_v19, 0.0 }
 0x7df   :  { %2301 = vmatpush.msk.msra.mxu1 %vm724_vm11, %v898_v59 }
 0x7e1   :  { %2302 = vmatpush.msk.msra.mxu1 %vm723_vm12, %v3060_v22 }
 0x7e2   :  { %2303 = vmatmul.msk.f32.vlgmr.msra.gmra.mxu1 %vm233_vm4, %v2725_v60  ;;  %v3139_v60 = vld [vmem:[%s3486_s1 + $0x4] sm:$0x7] }
 0x7e3   :  { %1336 = vmatpush.msrb.mxu1 %v2740_v9 }
 0x7e5   :  { %1337 = vmatpush.msrb.mxu1 %v3036_v53 }
 0x7e7   :  { %1338 = vmatpush.msrb.mxu1 %v3049_v27 }
 0x7e9   :  { %1339 = vmatpush.msrb.mxu1 %v3067_v44 }
 0x7eb   :  { %1340 = vmatpush.msrb.mxu1 %v1273_v52 }
 0x7ed   :  { %1341 = vmatpush.msrb.mxu1 %v1272_v26 }
 0x7ef   :  { %1342 = vmatpush.msrb.mxu1 %v1271_v23 }
 0x7f1   :  { %1343 = vmatpush.msrb.mxu1 %v1270_v54 }
 0x7f3   :  { %2341 = vmatpush.msk.msra.mxu1 %vm314_vm5, %v2690_v35 }
 0x802   :  { %v980_v35 = vpop.permute.xlu1 %979 }
 0x80a   :  { %v975_v45 = vpop.permute.xlu1 %974 }
 0x812   :  { %v970_v16 = vpop.permute.xlu1 %969 }
 0x81a   :  { %v965_v56 = vpop.permute.xlu1 %964 }
 0x822   :  { %v960_v39 = vpop.permute.xlu1 %959 }
 0x82a   :  { %v955_v22 = vpop.permute.xlu1 %954 }
 0x82c   :  { %v1319_v9 = vpop.f32.mrf.mxu0 }
 0x82d   :  { %2339 = vst.msk [vmem:[%s3487_s6 + $0xc] sm:$0x7] %vm230_vm3, %v1319_v9  ;;  %v1324_v31 = vsub.f32 %v1319_v9, %v3139_v60 }
 0x82f   :  { %1348 = vxpose.xlu2.b32.start.end [1/1] (short) (narrow) %v1324_v31, 64  ;;  %2340 = vmatmul.msk.f32.vlgmr.msrb.gmra.mxu1 %vm233_vm4, %v1324_v31 }
 0x85f   :  { %v944_v17 = vpop.f32.mrf.mxu1 }
 0x860   :  { %v947_v53 = vmul.f32 5.2083335e-05, %v944_v17 }
 0x862   :  { %v948_v27 = vsub.f32 %v2850_v14, %v947_v53 }
 0x864   :  { %v992_v44 = vperm.slane %v948_v27, 0  ;;  %v3150_v52 = vperm.slane %v948_v27, 1  ;;  %v951_v59 = vperm.slane %v948_v27, 2 }
 0x866   :  { %v993_v26 = vmul.f32 %v992_v44, %v955_v22  ;;  %v1000_v23 = vmul.f32 %v992_v44, %v990_v0  ;;  %v999_v37 = vmul.f32 %v992_v44, %v985_v8  ;;  %v998_v54 = vmul.f32 %v992_v44, %v980_v35 }
 0x867   :  { %v997_v46 = vmul.f32 %v992_v44, %v975_v45  ;;  %v1049_v18 = vmul.f32 %v3150_v52, %v1039_v4  ;;  %v996_v58 = vmul.f32 %v992_v44, %v970_v16  ;;  %v1048_v14 = vmul.f32 %v3150_v52, %v1035_v11 }
 0x868   :  { %v3152_v20 = vadd.f32 %v993_v26, %v951_v59  ;;  %v1008_v5 = vadd.f32 %v1000_v23, %v951_v59  ;;  %v1007_v33 = vadd.f32 %v999_v37, %v951_v59  ;;  %v1006_v9 = vadd.f32 %v998_v54, %v951_v59 }
 0x869   :  { %v1005_v31 = vadd.f32 %v997_v46, %v951_v59  ;;  %v1004_v53 = vadd.f32 %v996_v58, %v951_v59  ;;  %v995_v27 = vmul.f32 %v992_v44, %v965_v56  ;;  %v994_v0 = vmul.f32 %v992_v44, %v960_v39 }
 0x86a   :  { %v1057_v17 = vadd.f32 %v1049_v18, %v1008_v5  ;;  %v1056_v22 = vadd.f32 %v1048_v14, %v1007_v33  ;;  %v3494_v16 = vmov 1   ;;  %v1214_v56 = vsel %vm113_vm0, %v2964_v40, 1.0 }
 0x86b   :  { %v1003_v35 = vadd.f32 %v995_v27, %v951_v59  ;;  %v3156_v45 = vadd.f32 %v994_v0, %v951_v59  ;;  %1453 = vxpose.xlu1.b32.start [1/8] (short) (narrow) %v1214_v56, 8  ;;  %v1215_v39 = vsel %vm113_vm0, %v2956_v63, 1.0  ;;  %v1216_v59 = vsel %vm113_vm0, %v2949_v51, 1.0 }
 0x86c   :  { %v1065_v8 = vmax.f32 %v1057_v17, 0.0  ;;  %v1064_v23 = vmax.f32 %v1056_v22, 0.0  ;;  %v3495_v46 = vmov 0   ;;  %v1217_v40 = vsel %vm113_vm0, %v2935_v49, 1.0 }
 0x86d   :  { %v1218_v63 = vsel %vm113_vm0, %v2928_v47, 1.0  ;;  %v1219_v51 = vsel %vm113_vm0, %v2921_v43, 1.0  ;;  %v1220_v49 = vsel %vm113_vm0, %v2916_v30, 1.0  ;;  %v2466_v47 = vld [vmem:[%s3483_s0 + $0x78] sm:$0xff]  ;;  %v1027_v43 = vpop.permute.xlu0 %1026 }
 0x86e   :  { %v1073_v26 = vsel %vm173_vm2, %v1065_v8, 1.0  ;;  %v1072_v4 = vsel %vm173_vm2, %v1064_v23, 1.0  ;;  %v1221_v58 = vsel %vm113_vm0, %v2466_v47, 1.0  ;;  %v1046_v22 = vmul.f32 %v3150_v52, %v1027_v43 }
 0x86f   :  { %2304 = vmatpush.xpose.msk.msra.mxu2 %vm182_vm1, %v1073_v26  ;;  %vm1261_vm0 = vcmp.gt.f32.partialorder %v2736_v6, 0.0 }
 0x870   :  { %v1054_v8 = vadd.f32 %v1046_v22, %v1005_v31 }
 0x872   :  { %v1062_v56 = vmax.f32 %v1054_v8, 0.0 }
 0x873   :  { %2305 = vmatpush.xpose.msk.msra.mxu2 %vm182_vm1, %v1072_v4  ;;  %1454 = vxpose.xlu1.b32.cont [2/8] (short) (narrow) %v1215_v39, 8 }
 0x875   :  { %v1023_v14 = vpop.permute.xlu0 %1022 }
 0x876   :  { %v1045_v4 = vmul.f32 %v3150_v52, %v1023_v14 }
 0x878   :  { %v1053_v39 = vadd.f32 %v1045_v4, %v1004_v53 }
 0x87b   :  { %1455 = vxpose.xlu1.b32.cont [3/8] (short) (narrow) %v1216_v59, 8  ;;  %v1070_v59 = vsel %vm173_vm2, %v1062_v56, 1.0 }
 0x87d   :  { %v1019_v17 = vpop.permute.xlu0 %1018 }
 0x883   :  { %1456 = vxpose.xlu1.b32.cont [4/8] (short) (narrow) %v1217_v40, 8 }
 0x885   :  { %v1015_v26 = vpop.permute.xlu0 %1014 }
 0x88b   :  { %1457 = vxpose.xlu1.b32.cont [5/8] (short) (narrow) %v1218_v63, 8 }
 0x88d   :  { %v1011_v31 = vpop.permute.xlu0 %1010 }
 0x88e   :  { %v1042_v53 = vmul.f32 %v3150_v52, %v1011_v31 }
 0x891   :  { %2451 = vset.pattern.permute.xlu2 %v3494_v16 }
 0x893   :  { %1458 = vxpose.xlu1.b32.cont [6/8] (short) (narrow) %v1219_v51, 8  ;;  %v1050_v51 = vadd.f32 %v1042_v53, %v3152_v20 }
 0x89b   :  { %1459 = vxpose.xlu1.b32.cont [7/8] (short) (narrow) %v1220_v49, 8 }
 0x8a3   :  { %1460 = vxpose.xlu1.b32.end [8/8] (short) (narrow) %v1221_v58, 8  ;;  %v949_v58 = vmul.f32 5.2083335e-05, %v3147_v10 }
 0x8a5   :  { %v950_v20 = vsub.f32 %v2843_v55, %v949_v58 }
 0x8c8   :  { %v1364_v37 = vpop.trf.xlu2 }
 0x8c9   :  { %2342 = vmatmul.msk.f32.vlgmr.msra.gmra.mxu1 %vm289_vm6, %v1364_v37 }
 0x8d0   :  { %1030 = vperm.xlu2 %2451, %v3097_v7   ;;  %v1365_v44 = vpop.trf.xlu2 }
 0x8d1   :  { %2343 = vmatmul.msk.f32.gmra.mxu1 %vm289_vm6, %v1365_v44  ;;  %v1044_v44 = vmul.f32 %v3150_v52, %v1019_v17 }
 0x8d3   :  { %v1052_v40 = vadd.f32 %v1044_v44, %v1003_v35  ;;  %v1345_v35 = vpop.f32.mrf.mxu1 }
 0x8d4   :  { %v1510_v55 = vmul.f32 5.2083335e-05, %v1345_v35 }
 0x8d5   :  { %v1060_v63 = vmax.f32 %v1052_v40, 0.0 }
 0x8d6   :  { %v3228_v57 = vsub.f32 %v2467_v41, %v1510_v55 }
 0x8d8   :  { %v1366_v54 = vpop.trf.xlu2  ;;  %2454 = vset.pattern.permute.xlu2 %v3495_v46 }
 0x8d9   :  { %2344 = vmatmul.msk.f32.gmra.mxu1 %vm289_vm6, %v1366_v54  ;;  %v1061_v54 = vmax.f32 %v1053_v39, 0.0 }
 0x8e0   :  { %v1367_v11 = vpop.trf.xlu2 }
 0x8e1   :  { %2345 = vmatmul.msk.f32.gmra.mxu1 %vm289_vm6, %v1367_v11  ;;  %v1069_v11 = vsel %vm173_vm2, %v1061_v54, 1.0 }
 0x8e8   :  { %v1368_v7 = vpop.trf.xlu2 }
 0x8e9   :  { %2346 = vmatmul.msk.f32.gmra.mxu1 %vm289_vm6, %v1368_v7 }
 0x8f0   :  { %v1369_v5 = vpop.trf.xlu2 }
 0x8f1   :  { %2347 = vmatmul.msk.f32.gmra.mxu1 %vm289_vm6, %v1369_v5  ;;  %v1068_v5 = vsel %vm173_vm2, %v1060_v63, 1.0 }
 0x8f6   :  { %2453 = vset.pattern.permute.xlu1 %v3494_v16 }
 0x8f8   :  { %v1370_v18 = vpop.trf.xlu2 }
 0x8f9   :  { %2348 = vmatmul.msk.f32.gmra.mxu1 %vm289_vm6, %v1370_v18  ;;  %v1058_v18 = vmax.f32 %v1050_v51, 0.0 }
 0x900   :  { %v1371_v33 = vpop.trf.xlu2 }
 0x901   :  { %2349 = vmatmul.msk.f32.gmra.mxu1 %vm289_vm6, %v1371_v33 }
 0x90f   :  { %v3222_v6 = vpop.trf.xlu1 }
 0x92a   :  { %v1031_v27 = vpop.permute.xlu2 %1030 }
 0x92b   :  { %v1047_v30 = vmul.f32 %v3150_v52, %v1031_v27 }
 0x92d   :  { %v1055_v0 = vadd.f32 %v1047_v30, %v1006_v9  ;;  %v1043_v9 = vmul.f32 %v3150_v52, %v1015_v26 }
 0x92f   :  { %v1063_v23 = vmax.f32 %v1055_v0, 0.0  ;;  %v1051_v7 = vadd.f32 %v1043_v9, %v3156_v45  ;;  %v1066_v45 = vsel %vm173_vm2, %v1058_v18, 1.0 }
 0x931   :  { %v1071_v37 = vsel %vm173_vm2, %v1063_v23, 1.0  ;;  %v1059_v49 = vmax.f32 %v1051_v7, 0.0 }
 0x932   :  { %2306 = vmatpush.xpose.msk.msra.mxu2 %vm182_vm1, %v1071_v37 }
 0x933   :  { %v1067_v47 = vsel %vm173_vm2, %v1059_v49, 1.0 }
 0x936   :  { %2307 = vmatpush.xpose.msk.msra.mxu2 %vm182_vm1, %v1070_v59 }
 0x93a   :  { %2308 = vmatpush.xpose.msk.msra.mxu2 %vm182_vm1, %v1069_v11 }
 0x93e   :  { %2309 = vmatpush.xpose.msk.msra.mxu2 %vm182_vm1, %v1068_v5 }
 0x942   :  { %2310 = vmatpush.xpose.msk.msra.mxu2 %vm182_vm1, %v1067_v47 }
 0x946   :  { %2311 = vmatpush.xpose.msk.msra.mxu2 %vm182_vm1, %v1066_v45  ;;  %v1421_v52 = vpop.f32.mrf.mxu1 }
 0x949   :  { %2312 = vmatmul.msk.f32.vlgmr.msra.gmra.mxu2 %vm182_vm1, %v950_v20 }
 0x94e   :  { %v1424_v33 = vpop.f32.mrf.mxu1 }
 0x956   :  { %v1427_v43 = vpop.f32.mrf.mxu1 }
 0x95e   :  { %v1430_v14 = vpop.f32.mrf.mxu1 }
 0x966   :  { %v1433_v17 = vpop.f32.mrf.mxu1 }
 0x96e   :  { %v1436_v27 = vpop.f32.mrf.mxu1 }
 0x976   :  { %v1439_v30 = vpop.f32.mrf.mxu1 }
 0x97e   :  { %v1442_v22 = vpop.f32.mrf.mxu1 }
 0x97f   :  { %2350 = vmatpush.msk.msrb.mxu2 %vm1261_vm0, %v1442_v22 }
 0x981   :  { %2351 = vmatpush.msk.msrb.mxu2 %vm1260_vm13, %v1439_v30 }
 0x983   :  { %2352 = vmatpush.msk.msrb.mxu2 %vm1259_vm14, %v1436_v27 }
 0x985   :  { %2353 = vmatpush.msk.msrb.mxu2 %vm1258_vm15, %v1433_v17 }
 0x987   :  { %2354 = vmatpush.msk.msrb.mxu2 %vm1257_vm7, %v1430_v14 }
 0x989   :  { %2355 = vmatpush.msk.msrb.mxu2 %vm1256_vm8, %v1427_v43 }
 0x98b   :  { %2356 = vmatpush.msk.msrb.mxu2 %vm1255_vm9, %v1424_v33 }
 0x98d   :  { %2357 = vmatpush.msk.msrb.mxu2 %vm1254_vm10, %v1421_v52 }
 0x98e   :  { %2358 = vmatmul.msk.f32.vlgmr.msrb.gmra.mxu2 %vm233_vm4, %v3222_v6 }
 0x98f   :  { %2370 = vmatpush.msk.msra.mxu2 %vm314_vm5, %v3228_v57 }
 0x9cc   :  { %v1118_v38 = vpop.f32.mrf.mxu2 }
 0x9cd   :  { %1121 = vst.msk [vmem:[%s3489_s5] sm:$0x7] %vm230_vm3, %v1118_v38 }
 0xa11   :  { %v1505_v2 = vpop.f32.mrf.mxu2 }
 0xa12   :  { %v1508_v34 = vmul.f32 5.2083335e-05, %v1505_v2 }
 0xa14   :  { %v3241_v19 = vsub.f32 %v2468_v21, %v1508_v34 }
 0xa16   :  { %v1513_v10 = vperm.slane %v3241_v19, 0  ;;  %v1530_v0 = vperm.slane %v3241_v19, 1  ;;  %v1512_v8 = vperm.slane %v3241_v19, 2 }
 0xa18   :  { %v1521_v26 = vmul.f32 %v1513_v10, %v2729_v1  ;;  %v1520_v23 = vmul.f32 %v1513_v10, %v2999_v29  ;;  %v1538_v4 = vmul.f32 %v1530_v0, %v2727_v61  ;;  %v1537_v37 = vmul.f32 %v1530_v0, %v2979_v32 }
 0xa19   :  { %v1519_v56 = vmul.f32 %v1513_v10, %v2981_v13  ;;  %v1518_v39 = vmul.f32 %v1513_v10, %v2985_v15  ;;  %v1536_v54 = vmul.f32 %v1530_v0, %v2983_v12  ;;  %v1517_v40 = vmul.f32 %v1513_v10, %v2989_v25 }
 0xa1a   :  { %v1529_v44 = vadd.f32 %v1521_v26, %v1512_v8  ;;  %v1528_v59 = vadd.f32 %v1520_v23, %v1512_v8  ;;  %v1535_v11 = vmul.f32 %v1530_v0, %v2987_v48  ;;  %v1516_v63 = vmul.f32 %v1513_v10, %v2993_v24 }
 0xa1b   :  { %v1527_v9 = vadd.f32 %v1519_v56, %v1512_v8  ;;  %v1526_v31 = vadd.f32 %v1518_v39, %v1512_v8  ;;  %v1525_v51 = vadd.f32 %v1517_v40, %v1512_v8  ;;  %v1515_v5 = vmul.f32 %v1513_v10, %v3013_v62 }
 0xa1c   :  { %v3256_v7 = vadd.f32 %v1538_v4, %v1529_v44  ;;  %v3258_v53 = vadd.f32 %v1537_v37, %v1528_v59  ;;  %v1534_v35 = vmul.f32 %v1530_v0, %v2991_v42  ;;  %v1524_v45 = vadd.f32 %v1516_v63, %v1512_v8 }
 0xa1d   :  { %v3261_v49 = vadd.f32 %v1536_v54, %v1527_v9  ;;  %v3266_v58 = vadd.f32 %v1535_v11, %v1526_v31  ;;  %v1533_v52 = vmul.f32 %v1530_v0, %v2997_v28  ;;  %v1514_v20 = vmul.f32 %v1513_v10, %v3052_v36 }
 0xa1e   :  { %v1562_v18 = vmax.f32 %v3256_v7, 0.0  ;;  %v1561_v47 = vmax.f32 %v3258_v53, 0.0  ;;  %v3272_v14 = vadd.f32 %v1534_v35, %v1525_v51  ;;  %v1523_v17 = vadd.f32 %v1515_v5, %v1512_v8 }
 0xa1f   :  { %v1560_v43 = vmax.f32 %v3261_v49, 0.0  ;;  %v1532_v27 = vmul.f32 %v1530_v0, %v3029_v50  ;;  %v1559_v22 = vmax.f32 %v3266_v58, 0.0  ;;  %v3278_v55 = vadd.f32 %v1533_v52, %v1524_v45 }
 0xa20   :  { %v1570_v33 = vsel %vm173_vm2, %v1562_v18, 1.0  ;;  %v1569_v30 = vsel %vm173_vm2, %v1561_v47, 1.0  ;;  %v1522_v41 = vadd.f32 %v1514_v20, %v1512_v8  ;;  %v1558_v2 = vmax.f32 %v3272_v14, 0.0 }
 0xa21   :  { %2359 = vmatpush.xpose.msk.msra.mxu3 %vm182_vm1, %v1570_v33  ;;  %1632 = vmatpush.msrb.mxu0 %v1570_v33  ;;  %v1568_v38 = vsel %vm173_vm2, %v1560_v43, 1.0  ;;  %v3282_v34 = vadd.f32 %v1532_v27, %v1523_v17  ;;  %v1531_v21 = vmul.f32 %v1530_v0, %v3070_v3  ;;  %v1567_v10 = vsel %vm173_vm2, %v1559_v22, 1.0 }
 0xa22   :  { %v1557_v26 = vmax.f32 %v3278_v55, 0.0  ;;  %v1566_v8 = vsel %vm173_vm2, %v1558_v2, 1.0  ;;  %vm1554_vm11 = vcmp.gt.f32.partialorder %v3256_v7, 0.0  ;;  %vm1553_vm12 = vcmp.gt.f32.partialorder %v3258_v53, 0.0 }
 0xa23   :  { %1633 = vmatpush.msrb.mxu0 %v1569_v30  ;;  %v3288_v23 = vadd.f32 %v1531_v21, %v1522_v41  ;;  %v1556_v4 = vmax.f32 %v3282_v34, 0.0  ;;  %vm1552_vm0 = vcmp.gt.f32.partialorder %v3261_v49, 0.0  ;;  %vm1551_vm13 = vcmp.gt.f32.partialorder %v3266_v58, 0.0 }
 0xa24   :  { %v1565_v37 = vsel %vm173_vm2, %v1557_v26, 1.0  ;;  %vm1550_vm14 = vcmp.gt.f32.partialorder %v3272_v14, 0.0  ;;  %vm1549_vm15 = vcmp.gt.f32.partialorder %v3278_v55, 0.0  ;;  %vm1548_vm7 = vcmp.gt.f32.partialorder %v3282_v34, 0.0 }
 0xa25   :  { %2360 = vmatpush.xpose.msk.msra.mxu3 %vm182_vm1, %v1569_v30  ;;  %1634 = vmatpush.msrb.mxu0 %v1568_v38  ;;  %v1555_v0 = vmax.f32 %v3288_v23, 0.0  ;;  %v1564_v56 = vsel %vm173_vm2, %v1556_v4, 1.0  ;;  %vm1547_vm8 = vcmp.gt.f32.partialorder %v3288_v23, 0.0 }
 0xa27   :  { %1635 = vmatpush.msrb.mxu0 %v1567_v10  ;;  %v1563_v39 = vsel %vm173_vm2, %v1555_v0, 1.0 }
 0xa29   :  { %2361 = vmatpush.xpose.msk.msra.mxu3 %vm182_vm1, %v1568_v38  ;;  %1636 = vmatpush.msrb.mxu0 %v1566_v8 }
 0xa2b   :  { %1637 = vmatpush.msrb.mxu0 %v1565_v37 }
 0xa2d   :  { %2362 = vmatpush.xpose.msk.msra.mxu3 %vm182_vm1, %v1567_v10  ;;  %1638 = vmatpush.msrb.mxu0 %v1564_v56 }
 0xa2f   :  { %1639 = vmatpush.msrb.mxu0 %v1563_v39 }
 0xa31   :  { %2363 = vmatpush.xpose.msk.msra.mxu3 %vm182_vm1, %v1566_v8 }
 0xa35   :  { %2364 = vmatpush.xpose.msk.msra.mxu3 %vm182_vm1, %v1565_v37 }
 0xa39   :  { %2365 = vmatpush.xpose.msk.msra.mxu3 %vm182_vm1, %v1564_v56 }
 0xa3d   :  { %2366 = vmatpush.xpose.msk.msra.mxu3 %vm182_vm1, %v1563_v39 }
 0xa40   :  { %2367 = vmatmul.msk.f32.vlgmr.msra.gmra.mxu3 %vm182_vm1, %v3228_v57 }
 0xac3   :  { %v1615_v44 = vpop.f32.mrf.mxu3 }
 0xac4   :  { %2368 = vst.msk [vmem:[%s3487_s6 + $0x10] sm:$0x7] %vm230_vm3, %v1615_v44  ;;  %v1620_v59 = vsub.f32 %v1615_v44, %v3139_v60 }
 0xac6   :  { %1644 = vxpose.xlu0.b32.start.end [1/1] (short) (narrow) %v1620_v59, 64  ;;  %2369 = vmatmul.msk.f32.vlgmr.msrb.gmra.mxu0 %vm233_vm4, %v1620_v59 }
 0xb43   :  { %v1641_v7 = vpop.f32.mrf.mxu0 }
 0xb6a   :  { %v1660_v54 = vpop.trf.xlu0 }
 0xb6b   :  { %2371 = vmatmul.msk.f32.vlgmr.msra.gmra.mxu2 %vm289_vm6, %v1660_v54 }
 0xb72   :  { %v1661_v40 = vpop.trf.xlu0 }
 0xb73   :  { %2372 = vmatmul.msk.f32.gmra.mxu2 %vm289_vm6, %v1661_v40 }
 0xb7a   :  { %v1662_v9 = vpop.trf.xlu0 }
 0xb7b   :  { %2373 = vmatmul.msk.f32.gmra.mxu2 %vm289_vm6, %v1662_v9 }
 0xb82   :  { %v1663_v31 = vpop.trf.xlu0 }
 0xb83   :  { %2374 = vmatmul.msk.f32.gmra.mxu2 %vm289_vm6, %v1663_v31 }
 0xb8a   :  { %v1664_v11 = vpop.trf.xlu0 }
 0xb8b   :  { %2375 = vmatmul.msk.f32.gmra.mxu2 %vm289_vm6, %v1664_v11 }
 0xb92   :  { %v1665_v63 = vpop.trf.xlu0 }
 0xb93   :  { %2376 = vmatmul.msk.f32.gmra.mxu2 %vm289_vm6, %v1665_v63 }
 0xb9a   :  { %v1666_v51 = vpop.trf.xlu0 }
 0xb9b   :  { %2377 = vmatmul.msk.f32.gmra.mxu2 %vm289_vm6, %v1666_v51 }
 0xba2   :  { %v1667_v5 = vpop.trf.xlu0 }
 0xba3   :  { %2378 = vmatmul.msk.f32.gmra.mxu2 %vm289_vm6, %v1667_v5 }
 0xbee   :  { %v1719_v35 = vpop.f32.mrf.mxu2 }
 0xbf6   :  { %v1722_v18 = vpop.f32.mrf.mxu2 }
 0xbfe   :  { %v1725_v47 = vpop.f32.mrf.mxu2 }
 0xc06   :  { %v1728_v45 = vpop.f32.mrf.mxu2 }
 0xc0e   :  { %v1731_v52 = vpop.f32.mrf.mxu2 }
 0xc16   :  { %v1734_v20 = vpop.f32.mrf.mxu2 }
 0xc1e   :  { %v1737_v33 = vpop.f32.mrf.mxu2 }
 0xc26   :  { %v1740_v43 = vpop.f32.mrf.mxu2 }
 0xc27   :  { %2379 = vmatpush.msk.msra.mxu0 %vm1554_vm11, %v1740_v43 }
 0xc29   :  { %2380 = vmatpush.msk.msra.mxu0 %vm1553_vm12, %v1737_v33 }
 0xc2b   :  { %2381 = vmatpush.msk.msra.mxu0 %vm1552_vm0, %v1734_v20 }
 0xc2d   :  { %2382 = vmatpush.msk.msra.mxu0 %vm1551_vm13, %v1731_v52 }
 0xc2f   :  { %2383 = vmatpush.msk.msra.mxu0 %vm1550_vm14, %v1728_v45 }
 0xc31   :  { %2384 = vmatpush.msk.msra.mxu0 %vm1549_vm15, %v1725_v47 }
 0xc33   :  { %2385 = vmatpush.msk.msra.mxu0 %vm1548_vm7, %v1722_v18  ;;  %v1773_v18 = vmul.f32 5.2083335e-05, %v1641_v7 }
 0xc35   :  { %2386 = vmatpush.msk.msra.mxu0 %vm1547_vm8, %v1719_v35  ;;  %v3386_v52 = vsub.f32 %v3228_v57, %v1773_v18 }
 0xc36   :  { %2387 = vmatmul.msk.f32.vlgmr.msra.gmra.mxu0 %vm233_vm4, %v3222_v6 }
 0xcb3   :  { %v1768_v53 = vpop.f32.mrf.mxu0 }
 0xcb4   :  { %v1771_v49 = vmul.f32 5.2083335e-05, %v1768_v53 }
 0xcb6   :  { %v3329_v58 = vsub.f32 %v3241_v19, %v1771_v49 }
 0xcb8   :  { %v1776_v14 = vperm.slane %v3329_v58, 0  ;;  %v1793_v17 = vperm.slane %v3329_v58, 1  ;;  %v1775_v27 = vperm.slane %v3329_v58, 2 }
 0xcba   :  { %v1784_v30 = vmul.f32 %v1776_v14, %v2729_v1  ;;  %v1783_v22 = vmul.f32 %v1776_v14, %v2999_v29  ;;  %v1801_v55 = vmul.f32 %v1793_v17, %v2727_v61  ;;  %v1800_v41 = vmul.f32 %v1793_v17, %v2979_v32 }
 0xcbb   :  { %v1782_v38 = vmul.f32 %v1776_v14, %v2981_v13  ;;  %v1781_v2 = vmul.f32 %v1776_v14, %v2985_v15  ;;  %v1799_v21 = vmul.f32 %v1793_v17, %v2983_v12  ;;  %v1780_v10 = vmul.f32 %v1776_v14, %v2989_v25 }
 0xcbc   :  { %v1792_v19 = vadd.f32 %v1784_v30, %v1775_v27  ;;  %v1791_v34 = vadd.f32 %v1783_v22, %v1775_v27  ;;  %v1798_v1 = vmul.f32 %v1793_v17, %v2987_v48  ;;  %v1779_v29 = vmul.f32 %v1776_v14, %v2993_v24  ;;  %v2328_v30 = vld [vmem:[%s3488_s2 + $0x70] sm:$0xff] }
 0xcbd   :  { %v1790_v26 = vadd.f32 %v1782_v38, %v1775_v27  ;;  %v1789_v23 = vadd.f32 %v1781_v2, %v1775_v27  ;;  %v1788_v32 = vadd.f32 %v1780_v10, %v1775_v27  ;;  %v1778_v13 = vmul.f32 %v1776_v14, %v3013_v62  ;;  %2071 = vperm.xlu2 %2454, %v2328_v30  }
 0xcbe   :  { %v3344_v8 = vadd.f32 %v1801_v55, %v1792_v19  ;;  %v3346_v61 = vadd.f32 %v1800_v41, %v1791_v34  ;;  %v1797_v4 = vmul.f32 %v1793_v17, %v2991_v42  ;;  %v1787_v48 = vadd.f32 %v1779_v29, %v1775_v27  ;;  %v2327_v41 = vld [vmem:[%s3488_s2 + $0x68] sm:$0xff]  ;;  %v2326_v34 = vld [vmem:[%s3488_s2 + $0x60] sm:$0xff] }
 0xcbf   :  { %v3349_v15 = vadd.f32 %v1799_v21, %v1790_v26  ;;  %v3354_v37 = vadd.f32 %v1798_v1, %v1789_v23  ;;  %v1796_v24 = vmul.f32 %v1793_v17, %v2997_v28  ;;  %v1777_v0 = vmul.f32 %v1776_v14, %v3052_v36  ;;  %v2329_v26 = vld [vmem:[%s3488_s2 + $0x78] sm:$0xff]  ;;  %v2323_v1 = vld [vmem:[%s3488_s2 + $0x48] sm:$0xff] }
 0xcc0   :  { %v1825_v12 = vmax.f32 %v3344_v8, 0.0  ;;  %v1824_v25 = vmax.f32 %v3346_v61, 0.0  ;;  %v3360_v62 = vadd.f32 %v1797_v4, %v1788_v32  ;;  %v1786_v44 = vadd.f32 %v1778_v13, %v1775_v27  ;;  %v2325_v23 = vld [vmem:[%s3488_s2 + $0x58] sm:$0xff]  ;;  %2125 = vperm.xlu1 %2453, %v2329_v26   ;;  %v2322_v32 = vld [vmem:[%s3488_s2 + $0x40] sm:$0xff]  ;;  %v2324_v4 = vld [vmem:[%s3488_s2 + $0x50] sm:$0xff] }
 0xcc1   :  { %v1823_v39 = vmax.f32 %v3349_v15, 0.0  ;;  %v1795_v42 = vmul.f32 %v1793_v17, %v3029_v50  ;;  %v1822_v54 = vmax.f32 %v3354_v37, 0.0  ;;  %v3366_v40 = vadd.f32 %v1796_v24, %v1787_v48 }
 0xcc2   :  { %v1833_v56 = vsel %vm173_vm2, %v1825_v12, 1.0  ;;  %v1832_v59 = vsel %vm173_vm2, %v1824_v25, 1.0  ;;  %v1785_v28 = vadd.f32 %v1777_v0, %v1775_v27  ;;  %v1821_v9 = vmax.f32 %v3360_v62, 0.0 }
 0xcc3   :  { %2388 = vmatpush.xpose.msk.msrb.mxu3 %vm182_vm1, %v1833_v56  ;;  %1895 = vmatpush.msrb.mxu0 %v1833_v56  ;;  %v1831_v36 = vsel %vm173_vm2, %v1823_v39, 1.0  ;;  %v3370_v31 = vadd.f32 %v1795_v42, %v1786_v44  ;;  %v1794_v11 = vmul.f32 %v1793_v17, %v3070_v3  ;;  %v1830_v50 = vsel %vm173_vm2, %v1822_v54, 1.0 }
 0xcc4   :  { %v1820_v63 = vmax.f32 %v3366_v40, 0.0  ;;  %v1829_v5 = vsel %vm173_vm2, %v1821_v9, 1.0  ;;  %vm1815_vm9 = vcmp.gt.f32.partialorder %v3349_v15, 0.0  ;;  %vm1814_vm10 = vcmp.gt.f32.partialorder %v3354_v37, 0.0 }
 0xcc5   :  { %1896 = vmatpush.msrb.mxu0 %v1832_v59  ;;  %v3376_v51 = vadd.f32 %v1794_v11, %v1785_v28  ;;  %v1819_v35 = vmax.f32 %v3370_v31, 0.0  ;;  %2455 = vset.pattern.permute.xlu2 %v3494_v16  ;;  %vm1813_vm11 = vcmp.gt.f32.partialorder %v3360_v62, 0.0  ;;  %vm1812_vm12 = vcmp.gt.f32.partialorder %v3366_v40, 0.0 }
 0xcc6   :  { %v1828_v3 = vsel %vm173_vm2, %v1820_v63, 1.0  ;;  %2121 = vperm.xlu2 %2455, %v2328_v30   ;;  %vm1811_vm0 = vcmp.gt.f32.partialorder %v3370_v31, 0.0 }
 0xcc7   :  { %2389 = vmatpush.xpose.msk.msrb.mxu3 %vm182_vm1, %v1832_v59  ;;  %1897 = vmatpush.msrb.mxu0 %v1831_v36  ;;  %v1818_v47 = vmax.f32 %v3376_v51, 0.0  ;;  %v1827_v45 = vsel %vm173_vm2, %v1819_v35, 1.0  ;;  %vm1810_vm13 = vcmp.gt.f32.partialorder %v3376_v51, 0.0 }
 0xcc8   :  { %2464 = vset.pattern.permute.xlu1 %v3495_v46 }
 0xcc9   :  { %1898 = vmatpush.msrb.mxu0 %v1830_v50  ;;  %v1826_v20 = vsel %vm173_vm2, %v1818_v47, 1.0  ;;  %2046 = vperm.xlu1 %2464, %v2323_v1  }
 0xccb   :  { %2390 = vmatpush.xpose.msk.msrb.mxu3 %vm182_vm1, %v1831_v36  ;;  %1899 = vmatpush.msrb.mxu0 %v1829_v5 }
 0xccd   :  { %1900 = vmatpush.msrb.mxu0 %v1828_v3 }
 0xcce   :  { %2456 = vset.pattern.permute.xlu2 %v3495_v46 }
 0xccf   :  { %2391 = vmatpush.xpose.msk.msrb.mxu3 %vm182_vm1, %v1830_v50  ;;  %1901 = vmatpush.msrb.mxu0 %v1827_v45 }
 0xcd0   :  { %2066 = vperm.xlu2 %2456, %v2327_v41  }
 0xcd1   :  { %1902 = vmatpush.msrb.mxu0 %v1826_v20  ;;  %2041 = vperm.xlu1 %2464, %v2322_v32  }
 0xcd3   :  { %2399 = vmatpush.msk.msra.mxu0 %vm314_vm5, %v3386_v52  ;;  %2392 = vmatpush.xpose.msk.msrb.mxu3 %vm182_vm1, %v1829_v5  ;;  %vm1817_vm5 = vcmp.gt.f32.partialorder %v3344_v8, 0.0 }
 0xcd7   :  { %2393 = vmatpush.xpose.msk.msrb.mxu3 %vm182_vm1, %v1828_v3 }
 0xcd8   :  { %2457 = vset.pattern.permute.xlu2 %v3494_v16 }
 0xcd9   :  { %2117 = vperm.xlu2 %2457, %v2327_v41  }
 0xcdb   :  { %2394 = vmatpush.xpose.msk.msrb.mxu3 %vm182_vm1, %v1827_v45 }
 0xcdf   :  { %2395 = vmatpush.xpose.msk.msrb.mxu3 %vm182_vm1, %v1826_v20 }
 0xce1   :  { %2458 = vset.pattern.permute.xlu2 %v3495_v46 }
 0xce2   :  { %2396 = vmatmul.msk.f32.vlgmr.msrb.gmra.mxu3 %vm182_vm1, %v3386_v52  ;;  %2061 = vperm.xlu2 %2458, %v2326_v34  }
 0xcea   :  { %2459 = vset.pattern.permute.xlu2 %v3494_v16 }
 0xceb   :  { %2113 = vperm.xlu2 %2459, %v2326_v34  }
 0xcf3   :  { %2460 = vset.pattern.permute.xlu2 %v3495_v46 }
 0xcf4   :  { %2056 = vperm.xlu2 %2460, %v2325_v23  }
 0xcfc   :  { %2461 = vset.pattern.permute.xlu2 %v3494_v16 }
 0xcfd   :  { %2109 = vperm.xlu2 %2461, %v2325_v23  }
 0xd05   :  { %2462 = vset.pattern.permute.xlu2 %v3495_v46 }
 0xd06   :  { %2051 = vperm.xlu2 %2462, %v2324_v4  }
 0xd0e   :  { %2463 = vset.pattern.permute.xlu2 %v3494_v16 }
 0xd0f   :  { %2105 = vperm.xlu2 %2463, %v2324_v4  }
 0xd17   :  { %2101 = vperm.xlu2 %2463, %v2323_v1  }
 0xd1f   :  { %2097 = vperm.xlu2 %2463, %v2322_v32  }
 0xd32   :  { %v2126_v39 = vpop.permute.xlu1 %2125 }
 0xd3b   :  { %v2047_v35 = vpop.permute.xlu1 %2046 }
 0xd43   :  { %v2042_v30 = vpop.permute.xlu1 %2041 }
 0xd65   :  { %v1878_v33 = vpop.f32.mrf.mxu3 }
 0xd66   :  { %2397 = vst.msk [vmem:[%s3487_s6 + $0x14] sm:$0x7] %vm230_vm3, %v1878_v33  ;;  %v1883_v57 = vsub.f32 %v1878_v33, %v3139_v60 }
 0xd68   :  { %1907 = vxpose.xlu0.b32.start.end [1/1] (short) (narrow) %v1883_v57, 64  ;;  %2398 = vmatmul.msk.f32.vlgmr.msrb.gmra.mxu0 %vm233_vm4, %v1883_v57 }
 0xdcf   :  { %2452 = vset.pattern.permute.xlu0 %v3495_v46  ;;  %v2072_v46 = vpop.permute.xlu2 %2071 }
 0xdd7   :  { %v2122_v8 = vpop.permute.xlu2 %2121 }
 0xde5   :  { %v3415_v22 = vpop.f32.mrf.mxu0 }
 0xe0c   :  { %v1923_v43 = vpop.trf.xlu0 }
 0xe0d   :  { %2400 = vmatmul.msk.f32.vlgmr.msra.gmra.mxu0 %vm289_vm6, %v1923_v43 }
 0xe0e   :  { %2076 = vperm.xlu0 %2452, %v2329_v26  }
 0xe14   :  { %v1924_v7 = vpop.trf.xlu0 }
 0xe15   :  { %2401 = vmatmul.msk.f32.gmra.mxu0 %vm289_vm6, %v1924_v7 }
 0xe16   :  { %2465 = vset.pattern.permute.xlu0 %v3494_v16 }
 0xe1c   :  { %v1925_v53 = vpop.trf.xlu0 }
 0xe1d   :  { %2402 = vmatmul.msk.f32.gmra.mxu0 %vm289_vm6, %v1925_v53 }
 0xe24   :  { %v1926_v49 = vpop.trf.xlu0 }
 0xe25   :  { %2403 = vmatmul.msk.f32.gmra.mxu0 %vm289_vm6, %v1926_v49 }
 0xe2c   :  { %v1927_v14 = vpop.trf.xlu0 }
 0xe2d   :  { %2404 = vmatmul.msk.f32.gmra.mxu0 %vm289_vm6, %v1927_v14 }
 0xe34   :  { %v1928_v60 = vpop.trf.xlu0 }
 0xe35   :  { %2405 = vmatmul.msk.f32.gmra.mxu0 %vm289_vm6, %v1928_v60 }
 0xe3c   :  { %v1929_v17 = vpop.trf.xlu0 }
 0xe3d   :  { %2406 = vmatmul.msk.f32.gmra.mxu0 %vm289_vm6, %v1929_v17 }
 0xe44   :  { %v1930_v27 = vpop.trf.xlu0 }
 0xe45   :  { %2407 = vmatmul.msk.f32.gmra.mxu0 %vm289_vm6, %v1930_v27  ;;  %vm1816_vm6 = vcmp.gt.f32.partialorder %v3346_v61, 0.0  ;;  %v2067_v61 = vpop.permute.xlu2 %2066 }
 0xe4d   :  { %v2118_v15 = vpop.permute.xlu2 %2117 }
 0xe55   :  { %v2062_v12 = vpop.permute.xlu2 %2061 }
 0xe5d   :  { %v2114_v25 = vpop.permute.xlu2 %2113 }
 0xe65   :  { %v2057_v37 = vpop.permute.xlu2 %2056 }
 0xe6d   :  { %v2110_v48 = vpop.permute.xlu2 %2109 }
 0xe75   :  { %v2052_v24 = vpop.permute.xlu2 %2051 }
 0xe7d   :  { %v2106_v9 = vpop.permute.xlu2 %2105 }
 0xe80   :  { %v2077_v62 = vpop.permute.xlu0 %2076 }
 0xe85   :  { %v2102_v60 = vpop.permute.xlu2 %2101 }
 0xe8a   :  { %v1982_v55 = vpop.f32.mrf.mxu0 }
 0xe92   :  { %v1985_v38 = vpop.f32.mrf.mxu0 }
 0xe9a   :  { %v1988_v2 = vpop.f32.mrf.mxu0 }
 0xea2   :  { %v1991_v19 = vpop.f32.mrf.mxu0 }
 0xeaa   :  { %v1994_v21 = vpop.f32.mrf.mxu0 }
 0xeb2   :  { %v1997_v10 = vpop.f32.mrf.mxu0 }
 0xeba   :  { %v2000_v29 = vpop.f32.mrf.mxu0 }
 0xec2   :  { %v2003_v13 = vpop.f32.mrf.mxu0 }
 0xec3   :  { %2408 = vmatpush.msk.msrb.mxu2 %vm1817_vm5, %v2003_v13 }
 0xec5   :  { %2409 = vmatpush.msk.msrb.mxu2 %vm1816_vm6, %v2000_v29  ;;  %v2098_v29 = vpop.permute.xlu2 %2097 }
 0xec7   :  { %2410 = vmatpush.msk.msrb.mxu2 %vm1815_vm9, %v1997_v10 }
 0xec9   :  { %2411 = vmatpush.msk.msrb.mxu2 %vm1814_vm10, %v1994_v21 }
 0xecb   :  { %2412 = vmatpush.msk.msrb.mxu2 %vm1813_vm11, %v1991_v19 }
 0xecd   :  { %2413 = vmatpush.msk.msrb.mxu2 %vm1812_vm12, %v1988_v2 }
 0xecf   :  { %2414 = vmatpush.msk.msrb.mxu2 %vm1811_vm0, %v1985_v38 }
 0xed1   :  { %2415 = vmatpush.msk.msrb.mxu2 %vm1810_vm13, %v1982_v55 }
 0xed2   :  { %2416 = vmatmul.msk.f32.vlgmr.msrb.gmra.mxu2 %vm233_vm4, %v3222_v6 }
 0xf55   :  { %v2031_v0 = vpop.f32.mrf.mxu2 }
 0xf56   :  { %v2034_v56 = vmul.f32 5.2083335e-05, %v2031_v0 }
 0xf58   :  { %v2035_v16 = vsub.f32 %v3329_v58, %v2034_v56 }
 0xf5a   :  { %v2079_v44 = vperm.slane %v2035_v16, 0  ;;  %v2128_v42 = vperm.slane %v2035_v16, 1  ;;  %v2038_v6 = vperm.slane %v2035_v16, 2 }
 0xf5c   :  { %v2087_v59 = vmul.f32 %v2079_v44, %v2077_v62  ;;  %v2086_v54 = vmul.f32 %v2079_v44, %v2072_v46  ;;  %v2085_v40 = vmul.f32 %v2079_v44, %v2067_v61  ;;  %v2136_v36 = vmul.f32 %v2128_v42, %v2126_v39 }
 0xf5d   :  { %v2135_v11 = vmul.f32 %v2128_v42, %v2122_v8  ;;  %v2084_v51 = vmul.f32 %v2079_v44, %v2062_v12  ;;  %v2134_v3 = vmul.f32 %v2128_v42, %v2118_v15  ;;  %v2083_v58 = vmul.f32 %v2079_v44, %v2057_v37 }
 0xf5e   :  { %v2095_v28 = vadd.f32 %v2087_v59, %v2038_v6  ;;  %v2094_v31 = vadd.f32 %v2086_v54, %v2038_v6  ;;  %v2093_v63 = vadd.f32 %v2085_v40, %v2038_v6  ;;  %v2133_v57 = vmul.f32 %v2128_v42, %v2114_v25 }
 0xf5f   :  { %v2092_v33 = vadd.f32 %v2084_v51, %v2038_v6  ;;  %v2082_v43 = vmul.f32 %v2079_v44, %v2052_v24  ;;  %v2091_v14 = vadd.f32 %v2083_v58, %v2038_v6  ;;  %v2132_v17 = vmul.f32 %v2128_v42, %v2110_v48 }
 0xf60   :  { %v2144_v50 = vadd.f32 %v2136_v36, %v2095_v28  ;;  %v2143_v5 = vadd.f32 %v2135_v11, %v2094_v31  ;;  %v2142_v20 = vadd.f32 %v2134_v3, %v2093_v63  ;;  %v2081_v2 = vmul.f32 %v2079_v44, %v2047_v35 }
 0xf61   :  { %v2141_v49 = vadd.f32 %v2133_v57, %v2092_v33  ;;  %v2090_v27 = vadd.f32 %v2082_v43, %v2038_v6  ;;  %v2140_v38 = vadd.f32 %v2132_v17, %v2091_v14  ;;  %v2131_v19 = vmul.f32 %v2128_v42, %v2106_v9 }
 0xf62   :  { %v2152_v18 = vmax.f32 %v2144_v50, 0.0  ;;  %v2151_v45 = vmax.f32 %v2143_v5, 0.0  ;;  %v2150_v53 = vmax.f32 %v2142_v20, 0.0  ;;  %v2080_v34 = vmul.f32 %v2079_v44, %v2042_v30 }
 0xf63   :  { %v2149_v41 = vmax.f32 %v2141_v49, 0.0  ;;  %v2148_v10 = vmax.f32 %v2140_v38, 0.0  ;;  %v2139_v26 = vadd.f32 %v2131_v19, %v2090_v27  ;;  %v2089_v23 = vadd.f32 %v2081_v2, %v2038_v6 }
 0xf64   :  { %v2160_v47 = vsel %vm173_vm2, %v2152_v18, 1.0  ;;  %v2159_v7 = vsel %vm173_vm2, %v2151_v45, 1.0  ;;  %v2158_v55 = vsel %vm173_vm2, %v2150_v53, 1.0  ;;  %v2130_v1 = vmul.f32 %v2128_v42, %v2102_v60 }
 0xf65   :  { %2417 = vmatpush.xpose.msk.msra.mxu3 %vm182_vm1, %v2160_v47  ;;  %v2157_v21 = vsel %vm173_vm2, %v2149_v41, 1.0  ;;  %v2088_v32 = vadd.f32 %v2080_v34, %v2038_v6  ;;  %v2156_v13 = vsel %vm173_vm2, %v2148_v10, 1.0  ;;  %v2147_v4 = vmax.f32 %v2139_v26, 0.0 }
 0xf66   :  { %v2138_v46 = vadd.f32 %v2130_v1, %v2089_v23  ;;  %v2129_v8 = vmul.f32 %v2128_v42, %v2098_v29  ;;  %v2036_v48 = vmul.f32 5.2083335e-05, %v3415_v22 }
 0xf67   :  { %v2155_v15 = vsel %vm173_vm2, %v2147_v4, 1.0 }
 0xf68   :  { %v2137_v61 = vadd.f32 %v2129_v8, %v2088_v32  ;;  %v2146_v12 = vmax.f32 %v2138_v46, 0.0  ;;  %v2037_v0 = vsub.f32 %v3386_v52, %v2036_v48 }
 0xf69   :  { %2418 = vmatpush.xpose.msk.msra.mxu3 %vm182_vm1, %v2159_v7 }
 0xf6a   :  { %v2145_v25 = vmax.f32 %v2137_v61, 0.0  ;;  %v2154_v37 = vsel %vm173_vm2, %v2146_v12, 1.0 }
 0xf6c   :  { %v2153_v24 = vsel %vm173_vm2, %v2145_v25, 1.0 }
 0xf6d   :  { %2419 = vmatpush.xpose.msk.msra.mxu3 %vm182_vm1, %v2158_v55 }
 0xf71   :  { %2420 = vmatpush.xpose.msk.msra.mxu3 %vm182_vm1, %v2157_v21 }
 0xf75   :  { %2421 = vmatpush.xpose.msk.msra.mxu3 %vm182_vm1, %v2156_v13 }
 0xf79   :  { %2422 = vmatpush.xpose.msk.msra.mxu3 %vm182_vm1, %v2155_v15 }
 0xf7d   :  { %2423 = vmatpush.xpose.msk.msra.mxu3 %vm182_vm1, %v2154_v37 }
 0xf81   :  { %2424 = vmatpush.xpose.msk.msra.mxu3 %vm182_vm1, %v2153_v24 }
 0xf84   :  { %2425 = vmatmul.msk.f32.vlgmr.msra.gmra.mxu3 %vm182_vm1, %v2037_v0 }
0x1007   :  { %v2205_v56 = vpop.f32.mrf.mxu3 }
0x1008   :  { %2426 = vst.msk [vmem:[%s3489_s5 + $0x4] sm:$0x7] %vm230_vm3, %v2205_v56 }

</bundles_post_ra>
